<compile_context>
chip_gen: v7x
topology: tpu7x:2x2x1
jax: 0.10.0
libtpu: 0.0.40
codegen_flags: <defaults>
</compile_context>

<pallas_src>
import functools

import jax
import jax.numpy as jnp
import numpy as np
from jax.experimental import pallas as pl
from jax.experimental.pallas import tpu as pltpu

_LANES = 128


def _round_up(x, m):
    return (x + m - 1) // m * m


def _divisors_desc(n):
    return [d for d in range(n, 0, -1) if n % d == 0]


def _tile_bytes(shape, itemsize):
    """Conservative VMEM footprint of one buffer holding `shape`."""
    shape = tuple(shape)
    if len(shape) < 2:
        shape = (1,) * (2 - len(shape)) + shape
    lead = 1
    for d in shape[:-2]:
        lead *= d
    return lead * _round_up(shape[-2], 16) * _round_up(shape[-1], _LANES) * itemsize


def _ds(start, size, stride):
    return pl.ds(start, size) if stride == 1 else pl.ds(start, size, stride=stride)


def _mbconv_kernel(x_ref, w1_ref, wdw_ref, w2_ref, shift_ref, o_ref, act_ref, *,
                   NB, THI, Wp, Cin, Cp, K, S, THo, Wo, Wph, mxu_conv1):
    f32 = jnp.float32

    # ---- conv1 (1x1) + bn1 (scale folded into w1) + relu -------------------
    if mxu_conv1:
        x2d = x_ref[...].reshape(NB * THI * Wp, Cin)
        h = jnp.dot(x2d, w1_ref[...], preferred_element_type=f32)
        h = h.reshape(NB, THI, Wp, Cp)
    else:
        # Tiny Cin: Cin broadcast-FMAs on the VPU (a depth-Cin MXU pass would
        # be <Cin/128 utilized); math kept in f32 (v5e has no bf16 VPU).
        x_f = x_ref[...].astype(f32)
        w1 = w1_ref[...].astype(f32)                       # (Cin, Cp), loaded once
        h = x_f[..., 0:1] * w1[0]
        for c in range(1, Cin):
            h = h + x_f[..., c:c + 1] * w1[c]
    h = jnp.maximum(h + shift_ref[0:1, :], 0.0)
    act_ref[...] = h.astype(act_ref.dtype)                 # staged once in VMEM

    # ---- depthwise KxK stride S + bn2 (scale folded into wdw) + relu -------
    # Register accumulation (no per-tap accumulator RMW).  act is stored in
    # W-phase-major order, so each tap reads a dense W window of exactly Wo
    # output columns (stride-aware: no discarded stride-S work).
    wdw = wdw_ref[...].astype(f32)                         # (K*K, Cp), loaded once
    acc = None
    for kh in range(K):
        for kw in range(K):
            pw = (kw % S) * Wph + (kw // S)                # phase-major W offset
            patch = act_ref[:, _ds(kh, THo, S), pl.ds(pw, Wo), :].astype(f32)
            tap = patch * wdw[kh * K + kw]
            acc = tap if acc is None else acc + tap
    h2 = jnp.maximum(acc + shift_ref[1:2, :], 0.0)         # (NB, THo, Wo, Cp)

    # ---- conv2 (1x1) + bn3 (scale folded into w2), no relu -----------------
    h2m = h2.reshape(NB * THo * Wo, Cp).astype(w2_ref.dtype)
    out = jnp.dot(h2m, w2_ref[...], preferred_element_type=f32)
    out = out + shift_ref[2:3, :]
    o_ref[...] = out.reshape(NB, THo, Wo, Cp).astype(o_ref.dtype)


def mbconv_block_nhwc(x_nhwc, params, *, kernel_size, stride,
                      compute_dtype=jnp.bfloat16, out_dtype=jnp.float32,
                      batch_block=None, band_rows=None,
                      vmem_budget_bytes=24 * 1024 * 1024,
                      strip_channel_pad=True):
    """NHWC-native MBConv forward.  x_nhwc: (N, H, W, Cin) -> (N, Ho, Wo, Cout).

    With strip_channel_pad=False the lane-padded (N, Ho, Wo, Cp) activation is
    returned, letting a chained NHWC pipeline skip the extra HBM pass of the
    channel slice.
    """
    w1, wdw, w2, bn1, bn2, bn3 = params
    N, H, W, Cin = x_nhwc.shape
    Cout = w1.shape[1]
    K, S = kernel_size, stride
    assert H >= K and W >= K, (H, W, K)
    Ho = (H - K) // S + 1
    Wo = (W - K) // S + 1
    Cp = _round_up(Cout, _LANES)

    mxu_conv1 = Cin > 16
    Cin_k = _round_up(Cin, 8) if mxu_conv1 else Cin        # sublane-friendly MXU K

    # --- W phase-major layout so depthwise reads are dense along W ----------
    Wph = -(-W // S)
    Wp = Wph * S
    x = x_nhwc.astype(compute_dtype)
    if Cin_k != Cin:
        x = jnp.pad(x, ((0, 0), (0, 0), (0, 0), (0, Cin_k - Cin)))
    if Wp != W:
        x = jnp.pad(x, ((0, 0), (0, 0), (0, Wp - W), (0, 0)))
    if S > 1:
        perm = np.concatenate([np.arange(p, Wp, S) for p in range(S)])
        x = x[:, :, perm, :]

    # --- choose batch block and output-row band under a VMEM budget ---------
    cs = jnp.dtype(compute_dtype).itemsize
    os_ = jnp.dtype(out_dtype).itemsize

    def vmem_estimate(nb, tho):
        thi = (tho - 1) * S + K
        b = 2 * _tile_bytes((nb, thi, Wp, Cin_k), cs)       # x band, dbl-buffered
        b += 2 * _tile_bytes((nb, tho, Wo, Cp), os_)        # out band, dbl-buffered
        b += _tile_bytes((nb, thi, Wp, Cp), cs)             # staged conv1 act
        b += _tile_bytes((nb, tho, Wo, Cp), 4)              # f32 depthwise acc
        b += 2 * (_tile_bytes((Cin_k, Cp), cs) + _tile_bytes((K * K, Cp), cs)
                  + _tile_bytes((Cp, Cp), cs) + _tile_bytes((3, Cp), 4))
        return b

    nb_opts = [d for d in _divisors_desc(N) if d <= 8]
    if batch_block is not None:
        assert N % batch_block == 0, (N, batch_block)
        nb_opts = [batch_block]
    th_opts = [d for d in _divisors_desc(Ho)
               if band_rows is None or d <= band_rows]
    if not th_opts:
        th_opts = [1]
    fitting = [(nb, th) for nb in nb_opts for th in th_opts
               if vmem_estimate(nb, th) <= vmem_budget_bytes]
    if not fitting:
        fitting = [(nb_opts[-1], th_opts[-1])]
    multi = [t for t in fitting if (N // t[0]) * (Ho // t[1]) >= 2]
    nb, THo = max(multi or fitting, key=lambda t: (t[0] * t[1], t[1]))
    THI = (THo - 1) * S + K
    NBANDS = Ho // THo

    # --- per-band input row windows (halo rows duplicated on the cheap
    #     Cin-channel input; see TODO about pl.Element) ----------------------
    if NBANDS == 1:
        x_bands = x[:, :THI][:, None]                       # (N, 1, THI, Wp, Cin_k)
    else:
        rows = np.arange(NBANDS)[:, None] * (THo * S) + np.arange(THI)[None, :]
        x_bands = x[:, rows]                                # (N, NBANDS, THI, Wp, Cin_k)

    # --- fold BN scales into the conv weights; pad channels to 128 lanes ----
    def pad_c(a):
        return jnp.pad(a, [(0, 0)] * (a.ndim - 1) + [(0, Cp - Cout)])

    w1f = pad_c(w1 * bn1[0][None, :])
    if Cin_k != Cin:
        w1f = jnp.pad(w1f, ((0, Cin_k - Cin), (0, 0)))
    w1f = w1f.astype(compute_dtype)                                        # (Cin_k, Cp)
    wdwf = pad_c(wdw * bn2[0][None, :]).astype(compute_dtype)              # (K*K, Cp)
    w2f = jnp.pad(w2 * bn3[0][None, :],
                  ((0, Cp - Cout), (0, Cp - Cout))).astype(compute_dtype)  # (Cp, Cp)
    shifts = jnp.stack([pad_c(bn1[1]), pad_c(bn2[1]), pad_c(bn3[1])],
                       axis=0).astype(jnp.float32)                         # (3, Cp)

    kernel = functools.partial(
        _mbconv_kernel, NB=nb, THI=THI, Wp=Wp, Cin=Cin_k, Cp=Cp, K=K, S=S,
        THo=THo, Wo=Wo, Wph=Wph, mxu_conv1=mxu_conv1)

    vmem_limit = int(min(64 * 1024 * 1024,
                         max(2 * vmem_estimate(nb, THo), 16 * 1024 * 1024)))

    out_p = pl.pallas_call(
        kernel,
        out_shape=jax.ShapeDtypeStruct((N, Ho, Wo, Cp), out_dtype),
        grid_spec=pltpu.PrefetchScalarGridSpec(
            num_scalar_prefetch=0,
            grid=(N // nb, NBANDS),
            in_specs=[
                pl.BlockSpec((nb, None, THI, Wp, Cin_k),
                             lambda n, hb: (n, hb, 0, 0, 0)),
                pl.BlockSpec((Cin_k, Cp), lambda n, hb: (0, 0)),
                pl.BlockSpec((K * K, Cp), lambda n, hb: (0, 0)),
                pl.BlockSpec((Cp, Cp), lambda n, hb: (0, 0)),
                pl.BlockSpec((3, Cp), lambda n, hb: (0, 0)),
            ],
            out_specs=pl.BlockSpec((nb, THo, Wo, Cp),
                                   lambda n, hb: (n, hb, 0, 0)),
            scratch_shapes=[pltpu.VMEM((nb, THI, Wp, Cp), compute_dtype)],
        ),
        compiler_params=pltpu.CompilerParams(
            dimension_semantics=("parallel", "parallel"),
            vmem_limit_bytes=vmem_limit),
    )(x_bands, w1f, wdwf, w2f, shifts)

    if strip_channel_pad and Cp != Cout:
        return out_p[..., :Cout]
    return out_p


def mbconv_block(x_nchw, params, *, kernel_size, stride, **kwargs):
    """PyTorch-layout entry point: (N, Cin, H, W) -> (N, Cout, Ho, Wo).

    In an NHWC end-to-end pipeline call mbconv_block_nhwc directly and skip
    these transposes (each is an extra HBM pass done by XLA).
    """
    x_nhwc = jnp.transpose(x_nchw, (0, 2, 3, 1))
    out = mbconv_block_nhwc(x_nhwc, params, kernel_size=kernel_size,
                            stride=stride, **kwargs)
    return jnp.transpose(out, (0, 3, 1, 2))


def make_params(key, in_channels, out_channels, kernel_size):
    """Deterministic synthetic parameters matching the PyTorch module shapes."""
    ks = jax.random.split(key, 15)
    eps = 1e-5

    def fold_bn(kg, kb, km, kv, c):
        gamma = jax.random.uniform(kg, (c,), jnp.float32, 0.5, 1.5)
        beta = jax.random.normal(kb, (c,), jnp.float32) * 0.1
        mean = jax.random.normal(km, (c,), jnp.float32) * 0.1
        var = jax.random.uniform(kv, (c,), jnp.float32, 0.5, 1.5)
        scale = gamma / jnp.sqrt(var + eps)
        shift = beta - mean * scale
        return jnp.stack([scale, shift], axis=0)                  # (2, C)

    # conv1: (Cout, Cin, 1, 1) in torch -> (Cin, Cout)
    w1 = jax.random.normal(ks[0], (in_channels, out_channels), jnp.float32) * 0.1
    # dw_conv: (Cout, 1, K, K) in torch -> (K*K, Cout)
    wdw = jax.random.normal(ks[1], (kernel_size * kernel_size, out_channels),
                            jnp.float32) * 0.1
    # conv2: (Cout, Cout, 1, 1) in torch -> (Cout, Cout)
    w2 = jax.random.normal(ks[2], (out_channels, out_channels), jnp.float32) * 0.1

    bn1 = fold_bn(ks[3], ks[4], ks[5], ks[6], out_channels)
    bn2 = fold_bn(ks[7], ks[8], ks[9], ks[10], out_channels)
    bn3 = fold_bn(ks[11], ks[12], ks[13], ks[14], out_channels)
    return w1, wdw, w2, bn1, bn2, bn3


def reference_forward(x_nchw, params, *, kernel_size, stride):
    """Pure-JAX reference (same NHWC math) for correctness checking."""
    w1, wdw, w2, bn1, bn2, bn3 = params
    K, S = kernel_size, stride
    x = jnp.transpose(x_nchw, (0, 2, 3, 1)).astype(jnp.float32)
    h = jnp.einsum("nhwi,io->nhwo", x, w1)
    h = jnp.maximum(h * bn1[0] + bn1[1], 0.0)
    N, H, W, C = h.shape
    Ho = (H - K) // S + 1
    Wo = (W - K) // S + 1
    acc = jnp.zeros((N, Ho, Wo, C), jnp.float32)
    for kh in range(K):
        for kw in range(K):
            patch = h[:, kh:kh + Ho * S:S, kw:kw + Wo * S:S, :]
            acc = acc + patch * wdw[kh * K + kw]
    h2 = jnp.maximum(acc * bn2[0] + bn2[1], 0.0)
    out = jnp.einsum("nhwi,io->nhwo", h2, w2) * bn3[0] + bn3[1]
    return jnp.transpose(out, (0, 3, 1, 2))


if __name__ == "__main__":
    root = jax.random.PRNGKey(0)

    def run_case(case_id, *, N, Cin, H, W, Cout, K, S, compute_dtype,
                 band_rows=None, rtol=2e-3, atol=2e-3):
        kx, kp = jax.random.split(jax.random.fold_in(root, case_id))
        x = jax.random.normal(kx, (N, Cin, H, W), jnp.float32)
        params = make_params(kp, Cin, Cout, K)
        ref = reference_forward(x, params, kernel_size=K, stride=S)
        out = mbconv_block(x, params, kernel_size=K, stride=S,
                           compute_dtype=compute_dtype, band_rows=band_rows)
        out = jax.block_until_ready(out)
        assert out.shape == ref.shape, (case_id, out.shape, ref.shape)
        err = float(jnp.max(jnp.abs(out - ref)))
        assert jnp.allclose(out, ref, rtol=rtol, atol=atol), (case_id, err)

    # PyTorch-shaped toy config: stride-2 depthwise, tiny Cin (VPU conv1 path).
    run_case(0, N=2, Cin=4, H=16, W=16, Cout=8, K=3, S=2,
             compute_dtype=jnp.float32)
    # Default bf16 staging path (v6e/v7x MXUs); f32 accumulation, loose tol.
    run_case(1, N=2, Cin=4, H=16, W=16, Cout=8, K=3, S=2,
             compute_dtype=jnp.bfloat16, rtol=3e-2, atol=3e-2)
    # Multi-band spatial tiling + MXU conv1 path (Cin > 16) + stride 1.
    run_case(2, N=2, Cin=24, H=14, W=14, Cout=16, K=3, S=1,
             compute_dtype=jnp.float32, band_rows=4, rtol=5e-3, atol=5e-3)

    print("KERNEL_OK")
</pallas_src>

<mosaic_0001>
module attributes {stable_mosaic.version = 11 : i64} {
  func.func @_mbconv_kernel(%arg0: i32, %arg1: i32, %arg2: memref<1x1x15x16x4xf32, #tpu.memory_space<vmem>>, %arg3: memref<4x128xf32, #tpu.memory_space<vmem>>, %arg4: memref<9x128xf32, #tpu.memory_space<vmem>>, %arg5: memref<128x128xf32, #tpu.memory_space<vmem>>, %arg6: memref<3x128xf32, #tpu.memory_space<vmem>>, %arg7: memref<1x7x7x128xf32, #tpu.memory_space<vmem>>, %arg8: memref<1x15x16x128xf32, #tpu.memory_space<vmem>>) attributes {dimension_semantics = [#tpu.dimension_semantics<parallel>, #tpu.dimension_semantics<parallel>], iteration_bounds = array<i64: 2, 1>, scalar_prefetch = 0 : i64, scratch_operands = 1 : i64, tpu.core_type = #tpu.core_type<tc>, window_params = [{transform_indices = @transform_0, window_bounds = array<i64: 1, 1, 15, 16, 4>}, {pipeline_mode = #tpu.pipeline_mode<synchronous>, transform_indices = @transform_1, window_bounds = array<i64: 4, 128>}, {pipeline_mode = #tpu.pipeline_mode<synchronous>, transform_indices = @transform_2, window_bounds = array<i64: 9, 128>}, {pipeline_mode = #tpu.pipeline_mode<synchronous>, transform_indices = @transform_3, window_bounds = array<i64: 128, 128>}, {pipeline_mode = #tpu.pipeline_mode<synchronous>, transform_indices = @transform_4, window_bounds = array<i64: 3, 128>}, {transform_indices = @transform_5, window_bounds = array<i64: 1, 7, 7, 128>}]} {
    %c0 = arith.constant 0 : index
    %c0_0 = arith.constant 0 : index
    %c0_1 = arith.constant 0 : index
    %c0_2 = arith.constant 0 : index
    %c0_3 = arith.constant 0 : index
    %0 = vector.load %arg2[%c0, %c0_0, %c0_1, %c0_2, %c0_3] : memref<1x1x15x16x4xf32, #tpu.memory_space<vmem>>, vector<1x1x15x16x4xf32>
    %1 = vector.shape_cast %0 : vector<1x1x15x16x4xf32> to vector<1x15x16x4xf32>
    %c0_4 = arith.constant 0 : index
    %c0_5 = arith.constant 0 : index
    %2 = vector.load %arg3[%c0_4, %c0_5] : memref<4x128xf32, #tpu.memory_space<vmem>>, vector<4x128xf32>
    %3 = vector.extract_strided_slice %1 {offsets = [0, 0, 0, 0], sizes = [1, 15, 16, 1], strides = [1, 1, 1, 1]} : vector<1x15x16x4xf32> to vector<1x15x16x1xf32>
    %4 = vector.extract_strided_slice %2 {offsets = [0, 0], sizes = [1, 128], strides = [1, 1]} : vector<4x128xf32> to vector<1x128xf32>
    %5 = vector.shape_cast %4 : vector<1x128xf32> to vector<128xf32>
    %6 = vector.shape_cast %5 : vector<128xf32> to vector<1x1x1x128xf32>
    %7 = vector.broadcast %3 : vector<1x15x16x1xf32> to vector<1x15x16x128xf32>
    %8 = vector.broadcast %6 : vector<1x1x1x128xf32> to vector<1x15x16x128xf32>
    %9 = arith.mulf %7, %8 : vector<1x15x16x128xf32>
    %10 = vector.extract_strided_slice %1 {offsets = [0, 0, 0, 1], sizes = [1, 15, 16, 1], strides = [1, 1, 1, 1]} : vector<1x15x16x4xf32> to vector<1x15x16x1xf32>
    %11 = vector.extract_strided_slice %2 {offsets = [1, 0], sizes = [1, 128], strides = [1, 1]} : vector<4x128xf32> to vector<1x128xf32>
    %12 = vector.shape_cast %11 : vector<1x128xf32> to vector<128xf32>
    %13 = vector.shape_cast %12 : vector<128xf32> to vector<1x1x1x128xf32>
    %14 = vector.broadcast %10 : vector<1x15x16x1xf32> to vector<1x15x16x128xf32>
    %15 = vector.broadcast %13 : vector<1x1x1x128xf32> to vector<1x15x16x128xf32>
    %16 = arith.mulf %14, %15 : vector<1x15x16x128xf32>
    %17 = arith.addf %9, %16 : vector<1x15x16x128xf32>
    %18 = vector.extract_strided_slice %1 {offsets = [0, 0, 0, 2], sizes = [1, 15, 16, 1], strides = [1, 1, 1, 1]} : vector<1x15x16x4xf32> to vector<1x15x16x1xf32>
    %19 = vector.extract_strided_slice %2 {offsets = [2, 0], sizes = [1, 128], strides = [1, 1]} : vector<4x128xf32> to vector<1x128xf32>
    %20 = vector.shape_cast %19 : vector<1x128xf32> to vector<128xf32>
    %21 = vector.shape_cast %20 : vector<128xf32> to vector<1x1x1x128xf32>
    %22 = vector.broadcast %18 : vector<1x15x16x1xf32> to vector<1x15x16x128xf32>
    %23 = vector.broadcast %21 : vector<1x1x1x128xf32> to vector<1x15x16x128xf32>
    %24 = arith.mulf %22, %23 : vector<1x15x16x128xf32>
    %25 = arith.addf %17, %24 : vector<1x15x16x128xf32>
    %26 = vector.extract_strided_slice %1 {offsets = [0, 0, 0, 3], sizes = [1, 15, 16, 1], strides = [1, 1, 1, 1]} : vector<1x15x16x4xf32> to vector<1x15x16x1xf32>
    %27 = vector.extract_strided_slice %2 {offsets = [3, 0], sizes = [1, 128], strides = [1, 1]} : vector<4x128xf32> to vector<1x128xf32>
    %28 = vector.shape_cast %27 : vector<1x128xf32> to vector<128xf32>
    %29 = vector.shape_cast %28 : vector<128xf32> to vector<1x1x1x128xf32>
    %30 = vector.broadcast %26 : vector<1x15x16x1xf32> to vector<1x15x16x128xf32>
    %31 = vector.broadcast %29 : vector<1x1x1x128xf32> to vector<1x15x16x128xf32>
    %32 = arith.mulf %30, %31 : vector<1x15x16x128xf32>
    %33 = arith.addf %25, %32 : vector<1x15x16x128xf32>
    %c0_6 = arith.constant 0 : index
    %c0_7 = arith.constant 0 : index
    %34 = vector.load %arg6[%c0_6, %c0_7] : memref<3x128xf32, #tpu.memory_space<vmem>>, vector<1x128xf32>
    %35 = vector.shape_cast %34 : vector<1x128xf32> to vector<1x1x1x128xf32>
    %36 = vector.broadcast %35 : vector<1x1x1x128xf32> to vector<1x15x16x128xf32>
    %37 = arith.addf %33, %36 : vector<1x15x16x128xf32>
    %cst = arith.constant 0.000000e+00 : f32
    %38 = vector.broadcast %cst : f32 to vector<1x15x16x128xf32>
    %39 = arith.maximumf %37, %38 : vector<1x15x16x128xf32>
    %c0_8 = arith.constant 0 : index
    %c0_9 = arith.constant 0 : index
    %c0_10 = arith.constant 0 : index
    %c0_11 = arith.constant 0 : index
    %40 = vector.load %arg8[%c0_8, %c0_9, %c0_10, %c0_11] : memref<1x15x16x128xf32, #tpu.memory_space<vmem>>, vector<1x15x16x128xf32>
    tpu.vector_store %arg8[%c0_8, %c0_9, %c0_10, %c0_11], %39 {strides = array<i32>} : memref<1x15x16x128xf32, #tpu.memory_space<vmem>>, vector<1x15x16x128xf32>,
    %c0_12 = arith.constant 0 : index
    %c0_13 = arith.constant 0 : index
    %41 = vector.load %arg4[%c0_12, %c0_13] : memref<9x128xf32, #tpu.memory_space<vmem>>, vector<9x128xf32>
    %c0_14 = arith.constant 0 : index
    %c0_15 = arith.constant 0 : index
    %c0_16 = arith.constant 0 : index
    %c0_17 = arith.constant 0 : index
    %42 = tpu.strided_load %arg8[%c0_14, %c0_15, %c0_16, %c0_17] {strides = array<i32: 1, 2, 1, 1>} : memref<1x15x16x128xf32, #tpu.memory_space<vmem>>, vector<1x7x7x128xf32>
    %43 = vector.extract_strided_slice %41 {offsets = [0, 0], sizes = [1, 128], strides = [1, 1]} : vector<9x128xf32> to vector<1x128xf32>
    %44 = vector.shape_cast %43 : vector<1x128xf32> to vector<128xf32>
    %45 = vector.shape_cast %44 : vector<128xf32> to vector<1x1x1x128xf32>
    %46 = vector.broadcast %45 : vector<1x1x1x128xf32> to vector<1x7x7x128xf32>
    %47 = arith.mulf %42, %46 : vector<1x7x7x128xf32>
    %c0_18 = arith.constant 0 : index
    %c0_19 = arith.constant 0 : index
    %c8 = arith.constant 8 : index
    %c0_20 = arith.constant 0 : index
    %48 = tpu.strided_load %arg8[%c0_18, %c0_19, %c8, %c0_20] {strides = array<i32: 1, 2, 1, 1>} : memref<1x15x16x128xf32, #tpu.memory_space<vmem>>, vector<1x7x7x128xf32>
    %49 = vector.extract_strided_slice %41 {offsets = [1, 0], sizes = [1, 128], strides = [1, 1]} : vector<9x128xf32> to vector<1x128xf32>
    %50 = vector.shape_cast %49 : vector<1x128xf32> to vector<128xf32>
    %51 = vector.shape_cast %50 : vector<128xf32> to vector<1x1x1x128xf32>
    %52 = vector.broadcast %51 : vector<1x1x1x128xf32> to vector<1x7x7x128xf32>
    %53 = arith.mulf %48, %52 : vector<1x7x7x128xf32>
    %54 = arith.addf %47, %53 : vector<1x7x7x128xf32>
    %c0_21 = arith.constant 0 : index
    %c0_22 = arith.constant 0 : index
    %c1 = arith.constant 1 : index
    %c0_23 = arith.constant 0 : index
    %55 = tpu.strided_load %arg8[%c0_21, %c0_22, %c1, %c0_23] {strides = array<i32: 1, 2, 1, 1>} : memref<1x15x16x128xf32, #tpu.memory_space<vmem>>, vector<1x7x7x128xf32>
    %56 = vector.extract_strided_slice %41 {offsets = [2, 0], sizes = [1, 128], strides = [1, 1]} : vector<9x128xf32> to vector<1x128xf32>
    %57 = vector.shape_cast %56 : vector<1x128xf32> to vector<128xf32>
    %58 = vector.shape_cast %57 : vector<128xf32> to vector<1x1x1x128xf32>
    %59 = vector.broadcast %58 : vector<1x1x1x128xf32> to vector<1x7x7x128xf32>
    %60 = arith.mulf %55, %59 : vector<1x7x7x128xf32>
    %61 = arith.addf %54, %60 : vector<1x7x7x128xf32>
    %c0_24 = arith.constant 0 : index
    %c1_25 = arith.constant 1 : index
    %c0_26 = arith.constant 0 : index
    %c0_27 = arith.constant 0 : index
    %62 = tpu.strided_load %arg8[%c0_24, %c1_25, %c0_26, %c0_27] {strides = array<i32: 1, 2, 1, 1>} : memref<1x15x16x128xf32, #tpu.memory_space<vmem>>, vector<1x7x7x128xf32>
    %63 = vector.extract_strided_slice %41 {offsets = [3, 0], sizes = [1, 128], strides = [1, 1]} : vector<9x128xf32> to vector<1x128xf32>
    %64 = vector.shape_cast %63 : vector<1x128xf32> to vector<128xf32>
    %65 = vector.shape_cast %64 : vector<128xf32> to vector<1x1x1x128xf32>
    %66 = vector.broadcast %65 : vector<1x1x1x128xf32> to vector<1x7x7x128xf32>
    %67 = arith.mulf %62, %66 : vector<1x7x7x128xf32>
    %68 = arith.addf %61, %67 : vector<1x7x7x128xf32>
    %c0_28 = arith.constant 0 : index
    %c1_29 = arith.constant 1 : index
    %c8_30 = arith.constant 8 : index
    %c0_31 = arith.constant 0 : index
    %69 = tpu.strided_load %arg8[%c0_28, %c1_29, %c8_30, %c0_31] {strides = array<i32: 1, 2, 1, 1>} : memref<1x15x16x128xf32, #tpu.memory_space<vmem>>, vector<1x7x7x128xf32>
    %70 = vector.extract_strided_slice %41 {offsets = [4, 0], sizes = [1, 128], strides = [1, 1]} : vector<9x128xf32> to vector<1x128xf32>
    %71 = vector.shape_cast %70 : vector<1x128xf32> to vector<128xf32>
    %72 = vector.shape_cast %71 : vector<128xf32> to vector<1x1x1x128xf32>
    %73 = vector.broadcast %72 : vector<1x1x1x128xf32> to vector<1x7x7x128xf32>
    %74 = arith.mulf %69, %73 : vector<1x7x7x128xf32>
    %75 = arith.addf %68, %74 : vector<1x7x7x128xf32>
    %c0_32 = arith.constant 0 : index
    %c1_33 = arith.constant 1 : index
    %c1_34 = arith.constant 1 : index
    %c0_35 = arith.constant 0 : index
    %76 = tpu.strided_load %arg8[%c0_32, %c1_33, %c1_34, %c0_35] {strides = array<i32: 1, 2, 1, 1>} : memref<1x15x16x128xf32, #tpu.memory_space<vmem>>, vector<1x7x7x128xf32>
    %77 = vector.extract_strided_slice %41 {offsets = [5, 0], sizes = [1, 128], strides = [1, 1]} : vector<9x128xf32> to vector<1x128xf32>
    %78 = vector.shape_cast %77 : vector<1x128xf32> to vector<128xf32>
    %79 = vector.shape_cast %78 : vector<128xf32> to vector<1x1x1x128xf32>
    %80 = vector.broadcast %79 : vector<1x1x1x128xf32> to vector<1x7x7x128xf32>
    %81 = arith.mulf %76, %80 : vector<1x7x7x128xf32>
    %82 = arith.addf %75, %81 : vector<1x7x7x128xf32>
    %c0_36 = arith.constant 0 : index
    %c2 = arith.constant 2 : index
    %c0_37 = arith.constant 0 : index
    %c0_38 = arith.constant 0 : index
    %83 = tpu.strided_load %arg8[%c0_36, %c2, %c0_37, %c0_38] {strides = array<i32: 1, 2, 1, 1>} : memref<1x15x16x128xf32, #tpu.memory_space<vmem>>, vector<1x7x7x128xf32>
    %84 = vector.extract_strided_slice %41 {offsets = [6, 0], sizes = [1, 128], strides = [1, 1]} : vector<9x128xf32> to vector<1x128xf32>
    %85 = vector.shape_cast %84 : vector<1x128xf32> to vector<128xf32>
    %86 = vector.shape_cast %85 : vector<128xf32> to vector<1x1x1x128xf32>
    %87 = vector.broadcast %86 : vector<1x1x1x128xf32> to vector<1x7x7x128xf32>
    %88 = arith.mulf %83, %87 : vector<1x7x7x128xf32>
    %89 = arith.addf %82, %88 : vector<1x7x7x128xf32>
    %c0_39 = arith.constant 0 : index
    %c2_40 = arith.constant 2 : index
    %c8_41 = arith.constant 8 : index
    %c0_42 = arith.constant 0 : index
    %90 = tpu.strided_load %arg8[%c0_39, %c2_40, %c8_41, %c0_42] {strides = array<i32: 1, 2, 1, 1>} : memref<1x15x16x128xf32, #tpu.memory_space<vmem>>, vector<1x7x7x128xf32>
    %91 = vector.extract_strided_slice %41 {offsets = [7, 0], sizes = [1, 128], strides = [1, 1]} : vector<9x128xf32> to vector<1x128xf32>
    %92 = vector.shape_cast %91 : vector<1x128xf32> to vector<128xf32>
    %93 = vector.shape_cast %92 : vector<128xf32> to vector<1x1x1x128xf32>
    %94 = vector.broadcast %93 : vector<1x1x1x128xf32> to vector<1x7x7x128xf32>
    %95 = arith.mulf %90, %94 : vector<1x7x7x128xf32>
    %96 = arith.addf %89, %95 : vector<1x7x7x128xf32>
    %c0_43 = arith.constant 0 : index
    %c2_44 = arith.constant 2 : index
    %c1_45 = arith.constant 1 : index
    %c0_46 = arith.constant 0 : index
    %97 = tpu.strided_load %arg8[%c0_43, %c2_44, %c1_45, %c0_46] {strides = array<i32: 1, 2, 1, 1>} : memref<1x15x16x128xf32, #tpu.memory_space<vmem>>, vector<1x7x7x128xf32>
    %98 = vector.extract_strided_slice %41 {offsets = [8, 0], sizes = [1, 128], strides = [1, 1]} : vector<9x128xf32> to vector<1x128xf32>
    %99 = vector.shape_cast %98 : vector<1x128xf32> to vector<128xf32>
    %100 = vector.shape_cast %99 : vector<128xf32> to vector<1x1x1x128xf32>
    %101 = vector.broadcast %100 : vector<1x1x1x128xf32> to vector<1x7x7x128xf32>
    %102 = arith.mulf %97, %101 : vector<1x7x7x128xf32>
    %103 = arith.addf %96, %102 : vector<1x7x7x128xf32>
    %c1_47 = arith.constant 1 : index
    %c0_48 = arith.constant 0 : index
    %104 = vector.load %arg6[%c1_47, %c0_48] : memref<3x128xf32, #tpu.memory_space<vmem>>, vector<1x128xf32>
    %105 = vector.shape_cast %104 : vector<1x128xf32> to vector<1x1x1x128xf32>
    %106 = vector.broadcast %105 : vector<1x1x1x128xf32> to vector<1x7x7x128xf32>
    %107 = arith.addf %103, %106 : vector<1x7x7x128xf32>
    %cst_49 = arith.constant 0.000000e+00 : f32
    %108 = vector.broadcast %cst_49 : f32 to vector<1x7x7x128xf32>
    %109 = arith.maximumf %107, %108 : vector<1x7x7x128xf32>
    %110 = vector.shape_cast %109 : vector<1x7x7x128xf32> to vector<49x128xf32>
    %c0_50 = arith.constant 0 : index
    %c0_51 = arith.constant 0 : index
    %111 = vector.load %arg5[%c0_50, %c0_51] : memref<128x128xf32, #tpu.memory_space<vmem>>, vector<128x128xf32>
    %cst_52 = arith.constant dense<0.000000e+00> : vector<49x128xf32>
    %112 = tpu.matmul %110, %111, %cst_52 {dimension_numbers = #tpu.dot_dimension_numbers<[1], [0], [0], [1], [0, 0, 1, 1], [], []>} : vector<49x128xf32>, vector<128x128xf32>, vector<49x128xf32> -> vector<49x128xf32>
    %c2_53 = arith.constant 2 : index
    %c0_54 = arith.constant 0 : index
    %113 = vector.load %arg6[%c2_53, %c0_54] : memref<3x128xf32, #tpu.memory_space<vmem>>, vector<1x128xf32>
    %114 = vector.broadcast %113 : vector<1x128xf32> to vector<49x128xf32>
    %115 = arith.addf %112, %114 : vector<49x128xf32>
    %116 = vector.shape_cast %115 : vector<49x128xf32> to vector<1x7x7x128xf32>
    %c0_55 = arith.constant 0 : index
    %c0_56 = arith.constant 0 : index
    %c0_57 = arith.constant 0 : index
    %c0_58 = arith.constant 0 : index
    %117 = vector.load %arg7[%c0_55, %c0_56, %c0_57, %c0_58] : memref<1x7x7x128xf32, #tpu.memory_space<vmem>>, vector<1x7x7x128xf32>
    tpu.vector_store %arg7[%c0_55, %c0_56, %c0_57, %c0_58], %116 {strides = array<i32>} : memref<1x7x7x128xf32, #tpu.memory_space<vmem>>, vector<1x7x7x128xf32>,
    return
  }
  func.func @transform_0(%arg0: i32, %arg1: i32) -> (i32, i32, i32, i32, i32) {
    %c0_i32 = arith.constant 0 : i32
    %c0_i32_0 = arith.constant 0 : i32
    %c0_i32_1 = arith.constant 0 : i32
    %c0_i32_2 = arith.constant 0 : i32
    return %arg0, %arg1, %c0_i32, %c0_i32_0, %c0_i32_1 : i32, i32, i32, i32, i32
  }
  func.func @transform_1(%arg0: i32, %arg1: i32) -> (i32, i32) {
    %c0_i32 = arith.constant 0 : i32
    %c0_i32_0 = arith.constant 0 : i32
    %c0_i32_1 = arith.constant 0 : i32
    return %c0_i32, %c0_i32_0 : i32, i32
  }
  func.func @transform_2(%arg0: i32, %arg1: i32) -> (i32, i32) {
    %c0_i32 = arith.constant 0 : i32
    %c0_i32_0 = arith.constant 0 : i32
    %c0_i32_1 = arith.constant 0 : i32
    return %c0_i32, %c0_i32_0 : i32, i32
  }
  func.func @transform_3(%arg0: i32, %arg1: i32) -> (i32, i32) {
    %c0_i32 = arith.constant 0 : i32
    %c0_i32_0 = arith.constant 0 : i32
    %c0_i32_1 = arith.constant 0 : i32
    return %c0_i32, %c0_i32_0 : i32, i32
  }
  func.func @transform_4(%arg0: i32, %arg1: i32) -> (i32, i32) {
    %c0_i32 = arith.constant 0 : i32
    %c0_i32_0 = arith.constant 0 : i32
    %c0_i32_1 = arith.constant 0 : i32
    return %c0_i32, %c0_i32_0 : i32, i32
  }
  func.func @transform_5(%arg0: i32, %arg1: i32) -> (i32, i32, i32, i32) {
    %c0_i32 = arith.constant 0 : i32
    %c0_i32_0 = arith.constant 0 : i32
    %c0_i32_1 = arith.constant 0 : i32
    return %arg0, %arg1, %c0_i32, %c0_i32_0 : i32, i32, i32, i32
  }
}

</mosaic_0001>

<bundles_post_ra>
// kernel: tpu_custom_call.1
= control target key start
LH: loop header
LB: loop body
LE: loop exit
PB: predicated region body
PF: predicated region fallthrough
CT: control target
= control target key end

     0   :  { %s3172_s18 = smov 0   ;;  %s3174_s19 = smov 0   ;;  %s4319_s0 = inlined_call_operand.vmem [shape: f32[2,1,15,16,4], index: 0, kind: input, shape index: {}]   ;;  %s4320_s1 = inlined_call_operand.vmem [shape: f32[4,128], index: 1, kind: input, shape index: {}]   ;;  %s4321_s2 = inlined_call_operand.vmem [shape: f32[9,128], index: 2, kind: input, shape index: {}]   ;;  %s4322_s3 = inlined_call_operand.vmem [shape: f32[128,128], index: 3, kind: input, shape index: {}]   ;;  %s4323_s4 = inlined_call_operand.vmem [shape: f32[3,128], index: 4, kind: input, shape index: {}]   ;;  %s4324_s5 = inlined_call_operand.vmem [shape: f32[2,7,7,128], index: 5, kind: output, shape index: {}]  }
   0x1   :  { %s3176_s20 = smov 0  }
   0x2 LB: > { %s27_s21 = sadd.s32 1, %s3128_s19  ;;  %p2903_p0 = scmp.ge.s32.totalorder %s3132_s20, 1  ;;  %s3132_s20 = sphi %s3176_s20, %s15_s20   ;;  %s3128_s19 = sphi %s3174_s19, %s4378_s19   ;;  %s3124_s18 = sphi %s3172_s18, %s4377_s18  }
   0x3   : > { %p29_p1 = scmp.ge.s32.totalorder %s27_s21, 2  ;;  %p207_p2 = scmp.lt.s32.totalorder %s3132_s20, 3 }
   0x5   : > { %s4380_s21 = smov (%p29_p1, %s27_s21), 0  ;;  %p208_p3 = pnand %p2903_p0, %p207_p2 }
   0x7   : > { %211 = sbr.rel (%p208_p3) target bundleno = 739 (0x2e3), region = 40 }
   0xe   : > { %p243_p4 = scmp.lt.s32.totalorder %s3124_s18, 1  ;;  %v4325_v0 = vmov 1   ;;  %v3135_v1 = vmov 0   ;;  %v4328_v19 = vmov 3   ;;  %v4332_v23 = vmov 2  }
   0xf   : > { %3073 = vset.pattern.permute.xlu0 %v4325_v0  ;;  %3072 = vset.pattern.permute.xlu1 %v3135_v1  ;;  %vm3139_vm0 = vmmov 0  }
  0x10   : > { %s4382_s18 = smov (!%p243_p4, %s3124_s18), 1 }
  0x11   : > { %s3038_s22 = smul.u32 240, %s4382_s18 }
  0x12   : > { %s3039_s30 = smul.u32 56, %s4382_s18 }
  0x13   : > { %s3198_s25 = scalar_lea.vmem %s4319_s0, %s3038_s22 }
  0x14   : > { %v3201_v2 = vld [vmem:[%s3198_s25 + $0x10] sm:$0xff]  ;;  %v3204_v3 = vld [vmem:[%s3198_s25] sm:$0xff]  ;;  %v3209_v4 = vld [vmem:[%s3198_s25 + $0x18] sm:$0xff]  ;;  %s4227_s8 = scalar_lea.vmem %s4324_s5, %s3039_s30 }
  0x15   : > { %305 = vperm.xlu1 %3072, %v3201_v2   ;;  %478 = vperm.xlu0 %3073, %v3204_v3   ;;  %v3212_v5 = vld [vmem:[%s3198_s25 + $0x28] sm:$0xff]  ;;  %v3219_v6 = vld [vmem:[%s3198_s25 + $0x38] sm:$0xff]  ;;  %v3227_v8 = vld [vmem:[%s3198_s25 + $0x80] sm:$0xff] }
  0x16   : > { %v3222_v7 = vld [vmem:[%s3198_s25 + $0x48] sm:$0xff]  ;;  %v3232_v9 = vld [vmem:[%s3198_s25 + $0x58] sm:$0xff]  ;;  %v3243_v12 = vld [vmem:[%s3198_s25 + $0x50] sm:$0xff] }
  0x17   : > { %v3235_v10 = vld [vmem:[%s3198_s25 + $0xa8] sm:$0xff]  ;;  %v3248_v13 = vld [vmem:[%s3198_s25 + $0x78] sm:$0xff]  ;;  %v3256_v15 = vld [vmem:[%s3198_s25 + $0xc0] sm:$0xff] }
  0x18   : > { %v3240_v11 = vld [vmem:[%s3198_s25 + $0x68] sm:$0xff]  ;;  %v3261_v16 = vld [vmem:[%s3198_s25 + $0x98] sm:$0xff]  ;;  %v3271_v18 = vld [vmem:[%s3198_s25 + $0x20] sm:$0xff] }
  0x19   : > { %310 = vperm.xlu1 %3072, %v3209_v4   ;;  %498 = vperm.xlu0 %3073, %v3212_v5   ;;  %v3253_v14 = vld [vmem:[%s3198_s25 + $0x88] sm:$0xff]  ;;  %v3268_v17 = vld [vmem:[%s3198_s25 + $0xb8] sm:$0xff]  ;;  %v3296_v24 = vld [vmem:[%s3198_s25 + $0x90] sm:$0xff] }
  0x1a   : > { %v3277_v20 = vld [vmem:[%s3198_s25 + $0xc8] sm:$0xff]  ;;  %v3282_v21 = vld [vmem:[%s3198_s25 + $0xd8] sm:$0xff]  ;;  %v3311_v25 = vld [vmem:[%s3198_s25 + $0x40] sm:$0xff] }
  0x1b   : > { %v3287_v22 = vld [vmem:[%s3198_s25 + $0x8] sm:$0xff]  ;;  %v3320_v26 = vld [vmem:[%s3198_s25 + $0x30] sm:$0xff]  ;;  %v3330_v27 = vld [vmem:[%s3198_s25 + $0x60] sm:$0xff] }
  0x1c   : > { %v3333_v28 = vld [vmem:[%s3198_s25 + $0xa0] sm:$0xff]  ;;  %v3338_v29 = vld [vmem:[%s3198_s25 + $0x70] sm:$0xff]  ;;  %v3384_v41 = vld [vmem:[%s3198_s25 + $0xe8] sm:$0xff] }
  0x1d   : > { %320 = vperm.xlu1 %3072, %v3212_v5   ;;  %490 = vperm.xlu0 %3073, %v3209_v4   ;;  %v3350_v30 = vld [vmem:[%s3198_s25 + $0xb0] sm:$0xff]  ;;  %v3375_v38 = vld [vmem:[%s3198_s25 + $0xe0] sm:$0xff] }
  0x1e   : > { %v3366_v35 = vld [vmem:[%s3198_s25 + $0xd0] sm:$0xff] }
  0x21   : > { %330 = vperm.xlu1 %3072, %v3219_v6   ;;  %514 = vperm.xlu0 %3073, %v3222_v7  }
  0x25   : > { %340 = vperm.xlu1 %3072, %v3222_v7   ;;  %542 = vperm.xlu0 %3073, %v3227_v8  }
  0x29   : > { %350 = vperm.xlu1 %3072, %v3232_v9   ;;  %562 = vperm.xlu0 %3073, %v3235_v10  }
  0x2d   : > { %360 = vperm.xlu1 %3072, %v3240_v11   ;;  %518 = vperm.xlu0 %3073, %v3243_v12  }
  0x31   : > { %370 = vperm.xlu1 %3072, %v3248_v13   ;;  %522 = vperm.xlu0 %3073, %v3232_v9  }
  0x35   : > { %380 = vperm.xlu1 %3072, %v3253_v14   ;;  %574 = vperm.xlu0 %3073, %v3256_v15  }
  0x39   : > { %390 = vperm.xlu1 %3072, %v3261_v16   ;;  %554 = vperm.xlu0 %3073, %v3261_v16  }
  0x3d   : > { %400 = vperm.xlu1 %3072, %v3235_v10   ;;  %538 = vperm.xlu0 %3073, %v3248_v13  }
  0x41   : > { %410 = vperm.xlu1 %3072, %v3268_v17   ;;  %3092 = vset.pattern.permute.xlu0 %v4328_v19 }
  0x42   : > { %862 = vperm.xlu0 %3092, %v3271_v18  }
  0x45   : > { %420 = vperm.xlu1 %3072, %v3277_v20  }
  0x46   : > { %858 = vperm.xlu0 %3092, %v3209_v4  }
  0x49   : > { %430 = vperm.xlu1 %3072, %v3282_v21  }
  0x4a   : > { %910 = vperm.xlu0 %3092, %v3227_v8  }
  0x4d   : > { %3074 = vset.pattern.permute.xlu1 %v4325_v0 }
  0x4e   : > { %482 = vperm.xlu1 %3074, %v3287_v22   ;;  %930 = vperm.xlu0 %3092, %v3235_v10  }
  0x52   : > { %3075 = vset.pattern.permute.xlu1 %v4332_v23  ;;  %886 = vperm.xlu0 %3092, %v3243_v12  }
  0x53   : > { %662 = vperm.xlu1 %3075, %v3204_v3  }
  0x56   : > { %918 = vperm.xlu0 %3092, %v3296_v24  }
  0x57   : > { %3076 = vset.pattern.permute.xlu1 %v4325_v0 }
  0x58   : > { %486 = vperm.xlu1 %3076, %v3201_v2  }
  0x5a   : > { %946 = vperm.xlu0 %3092, %v3277_v20  }
  0x5c   : > { %494 = vperm.xlu1 %3076, %v3271_v18  }
  0x5e   : > { %922 = vperm.xlu0 %3092, %v3261_v16  }
  0x60   : > { %3077 = vset.pattern.permute.xlu1 %v4328_v19 }
  0x61   : > { %846 = vperm.xlu1 %3077, %v3204_v3  }
  0x62   : > { %906 = vperm.xlu0 %3092, %v3248_v13  }
  0x65   : > { %850 = vperm.xlu1 %3077, %v3287_v22  }
  0x66   : > { %3100 = vset.pattern.permute.xlu0 %v3135_v1 }
  0x67   : > { %295 = vperm.xlu0 %3100, %v3204_v3  }
  0x69   : > { %3078 = vset.pattern.permute.xlu1 %v4325_v0 }
  0x6a   : > { %510 = vperm.xlu1 %3078, %v3311_v25  }
  0x6b   : > { %300 = vperm.xlu0 %3100, %v3287_v22  }
  0x6e   : > { %3079 = vset.pattern.permute.xlu1 %v4332_v23 }
  0x6f   : > { %670 = vperm.xlu1 %3079, %v3201_v2   ;;  %315 = vperm.xlu0 %3100, %v3271_v18  }
  0x73   : > { %682 = vperm.xlu1 %3079, %v3212_v5   ;;  %325 = vperm.xlu0 %3100, %v3320_v26  }
  0x77   : > { %3080 = vset.pattern.permute.xlu1 %v4325_v0  ;;  %335 = vperm.xlu0 %3100, %v3311_v25  }
  0x78   : > { %502 = vperm.xlu1 %3080, %v3320_v26  }
  0x7b   : > { %345 = vperm.xlu0 %3100, %v3243_v12  }
  0x7c   : > { %546 = vperm.xlu1 %3080, %v3253_v14  }
  0x7f   : > { %355 = vperm.xlu0 %3100, %v3330_v27  }
  0x80   : > { %558 = vperm.xlu1 %3080, %v3333_v28  }
  0x83   : > { %365 = vperm.xlu0 %3100, %v3338_v29  }
  0x84   : > { %3081 = vset.pattern.permute.xlu1 %v4332_v23 }
  0x85   : > { %674 = vperm.xlu1 %3081, %v3209_v4  }
  0x87   : > { %375 = vperm.xlu0 %3100, %v3227_v8  }
  0x89   : > { %698 = vperm.xlu1 %3081, %v3222_v7  }
  0x8b   : > { %385 = vperm.xlu0 %3100, %v3296_v24  }
  0x8d   : > { %3082 = vset.pattern.permute.xlu1 %v4328_v19 }
  0x8e   : > { %854 = vperm.xlu1 %3082, %v3201_v2  }
  0x8f   : > { %395 = vperm.xlu0 %3100, %v3333_v28  }
  0x92   : > { %866 = vperm.xlu1 %3082, %v3212_v5   ;;  %v443_v5 = vlaneseq }
  0x93   : > { %405 = vperm.xlu0 %3100, %v3350_v30  }
  0x94   : > { %v3354_v31 = vpop.permute.xlu1 %305  ;;  %v3356_v32 = vpop.permute.xlu0 %478 }
  0x96   : > { %3083 = vset.pattern.permute.xlu1 %v4325_v0 }
  0x97   : > { %506 = vperm.xlu1 %3083, %v3219_v6   ;;  %415 = vperm.xlu0 %3100, %v3256_v15  }
  0x98   : > { %v3361_v33 = vpop.permute.xlu1 %310  ;;  %v3363_v34 = vpop.permute.xlu0 %498 }
  0x9b   : > { %526 = vperm.xlu1 %3083, %v3330_v27   ;;  %425 = vperm.xlu0 %3100, %v3366_v35  }
  0x9c   : > { %v3370_v36 = vpop.permute.xlu1 %320  ;;  %v3372_v37 = vpop.permute.xlu0 %490 }
  0x9f   : > { %530 = vperm.xlu1 %3083, %v3240_v11   ;;  %435 = vperm.xlu0 %3100, %v3375_v38  }
  0xa0   : > { %v3379_v39 = vpop.permute.xlu1 %330  ;;  %v3381_v40 = vpop.permute.xlu0 %514 }
  0xa1   : > { %4339 = vst [vmem:[#allocation3_spill] sm:$0xff] %v3379_v39 }
  0xa3   : > { %3084 = vset.pattern.permute.xlu1 %v4332_v23  ;;  %440 = vperm.xlu0 %3100, %v3384_v41  }
  0xa4   : > { %v3388_v42 = vpop.permute.xlu1 %340  ;;  %726 = vperm.xlu1 %3084, %v3227_v8   ;;  %v3391_v43 = vpop.permute.xlu0 %542 }
  0xa7   : > { %3104 = vset.pattern.permute.xlu0 %v4332_v23 }
  0xa8   : > { %v3394_v44 = vpop.permute.xlu1 %350  ;;  %730 = vperm.xlu1 %3084, %v3253_v14   ;;  %666 = vperm.xlu0 %3104, %v3287_v22   ;;  %v3398_v45 = vpop.permute.xlu0 %562  ;;  %v292_v22 = vld [vmem:[%s4320_s1] sm:$0xf] }
  0xa9   : > { %4340 = vst [vmem:[#allocation4_spill] sm:$0xff] %v3394_v44 }
  0xac   : > { %v3400_v46 = vpop.permute.xlu1 %360  ;;  %746 = vperm.xlu1 %3084, %v3235_v10   ;;  %678 = vperm.xlu0 %3104, %v3271_v18   ;;  %v3404_v47 = vpop.permute.xlu0 %518  ;;  %v3475_v10 = vshrl.u32 %v443_v5, 7 }
  0xad   : > { %4341 = vst [vmem:[#allocation5_spill] sm:$0xff] %v3400_v46 }
  0xae   : > { %4348 = vst [vmem:[#allocation12_spill] sm:$0xff] %v3475_v10  ;;  %v4331_v18 = vsub.s32 2, %v3475_v10 }
  0xb0   : > { %v3406_v48 = vpop.permute.xlu1 %370  ;;  %3085 = vset.pattern.permute.xlu1 %v4328_v19  ;;  %694 = vperm.xlu0 %3104, %v3311_v25   ;;  %v3410_v49 = vpop.permute.xlu0 %522 }
  0xb1   : > { %4342 = vst [vmem:[#allocation6_spill] sm:$0xff] %v3406_v48  ;;  %4343 = vst [vmem:[#allocation7_spill] sm:$0xff] %v3410_v49  ;;  %878 = vperm.xlu1 %3085, %v3311_v25   ;;  %v4334_v25 = vsub.s32 3, %v3475_v10  ;;  %v3523_v49 = vld [vmem:[%s4323_s4] ss:$0 sm:$0xff] }
  0xb4   : > { %v3413_v50 = vpop.permute.xlu1 %380  ;;  %686 = vperm.xlu0 %3104, %v3320_v26   ;;  %v3416_v51 = vpop.permute.xlu0 %574 }
  0xb5   : > { %4344 = vst [vmem:[#allocation8_spill] sm:$0xff] %v3413_v50  ;;  %882 = vperm.xlu1 %3085, %v3222_v7  }
  0xb8   : > { %v3419_v52 = vpop.permute.xlu1 %390  ;;  %742 = vperm.xlu0 %3104, %v3333_v28   ;;  %v3422_v53 = vpop.permute.xlu0 %554 }
  0xb9   : > { %3086 = vset.pattern.permute.xlu1 %v4325_v0 }
  0xba   : > { %550 = vperm.xlu1 %3086, %v3296_v24  }
  0xbc   : > { %v3426_v54 = vpop.permute.xlu1 %400  ;;  %690 = vperm.xlu0 %3104, %v3219_v6   ;;  %v3429_v55 = vpop.permute.xlu0 %538 }
  0xbd   : > { %4345 = vst [vmem:[#allocation9_spill] sm:$0xff] %v3429_v55 }
  0xbe   : > { %566 = vperm.xlu1 %3086, %v3350_v30  }
  0xc0   : > { %v3432_v56 = vpop.permute.xlu1 %410  ;;  %714 = vperm.xlu0 %3104, %v3240_v11  }
  0xc1   : > { %4346 = vst [vmem:[#allocation10_spill] sm:$0xff] %v3432_v56  ;;  %v3435_v57 = vpop.permute.xlu0 %862 }
  0xc2   : > { %578 = vperm.xlu1 %3086, %v3277_v20  }
  0xc4   : > { %v3438_v58 = vpop.permute.xlu1 %420  ;;  %734 = vperm.xlu0 %3104, %v3296_v24  }
  0xc5   : > { %v3441_v59 = vpop.permute.xlu0 %858 }
  0xc6   : > { %3087 = vset.pattern.permute.xlu1 %v4332_v23 }
  0xc7   : > { %702 = vperm.xlu1 %3087, %v3243_v12  }
  0xc8   : > { %v3445_v60 = vpop.permute.xlu1 %430  ;;  %762 = vperm.xlu0 %3104, %v3277_v20  }
  0xc9   : > { %4347 = vst [vmem:[#allocation11_spill] sm:$0xff] %v3445_v60  ;;  %v3448_v61 = vpop.permute.xlu0 %910 }
  0xcb   : > { %710 = vperm.xlu1 %3087, %v3330_v27  }
  0xcc   : > { %738 = vperm.xlu0 %3104, %v3261_v16   ;;  %v4330_v16 = vsub.s32 0, %v3475_v10 }
  0xcd   : > { %v3452_v62 = vpop.permute.xlu1 %482  ;;  %v3454_v63 = vpop.permute.xlu0 %930 }
  0xcf   : > { %3088 = vset.pattern.permute.xlu1 %v4328_v19 }
  0xd0   : > { %870 = vperm.xlu1 %3088, %v3320_v26   ;;  %722 = vperm.xlu0 %3104, %v3248_v13   ;;  %v4327_v13 = vsub.s32 1, %v3475_v10 }
  0xd1   : > { %v3459_v1 = vpop.permute.xlu0 %886 }
  0xd2   : > { %v663_v2 = vpop.permute.xlu1 %662  ;;  %v3491_v24 = vrot.slane %v292_v22, %v4327_v13 }
  0xd4   : > { %914 = vperm.xlu1 %3088, %v3253_v14   ;;  %774 = vperm.xlu0 %3104, %v3375_v38   ;;  %v601_v5 = vmul.f32 %v3491_v24, %v3356_v32 }
  0xd5   : > { %v3463_v3 = vpop.permute.xlu0 %918 }
  0xd7   : > { %v3465_v4 = vpop.permute.xlu1 %486 }
  0xd8   : > { %926 = vperm.xlu1 %3088, %v3333_v28   ;;  %3108 = vset.pattern.permute.xlu0 %v4328_v19  ;;  %v3498_v28 = vrot.slane %v292_v22, %v4330_v16  ;;  %v3510_v19 = vrot.slane %v292_v22, %v4334_v25  ;;  %v4351_v25 = vmov 3  }
  0xd9   : > { %v3469_v7 = vpop.permute.xlu0 %946  ;;  %962 = vperm.xlu0 %3108, %v3384_v41  }
  0xdb   : > { %v3472_v8 = vpop.permute.xlu1 %494 }
  0xdc   : > { %3089 = vset.pattern.permute.xlu1 %v4325_v0  ;;  %v3504_v0 = vrot.slane %v292_v22, %v4331_v18 }
  0xdd   : > { %534 = vperm.xlu1 %3089, %v3338_v29   ;;  %v3478_v12 = vpop.permute.xlu0 %922 }
  0xde   : > { %4349 = vst [vmem:[#allocation13_spill] sm:$0xff] %v3478_v12  ;;  %v785_v16 = vmul.f32 %v3504_v0, %v663_v2 }
  0xe0   : > { %v847_v14 = vpop.permute.xlu1 %846 }
  0xe1   : > { %570 = vperm.xlu1 %3089, %v3268_v17   ;;  %v3484_v20 = vpop.permute.xlu0 %906  ;;  %v969_v18 = vmul.f32 %v3510_v19, %v847_v14 }
  0xe2   : > { %4350 = vst [vmem:[#allocation14_spill] sm:$0xff] %v3484_v20 }
  0xe4   : > { %v3494_v26 = vpop.permute.xlu1 %850 }
  0xe5   : > { %3090 = vset.pattern.permute.xlu1 %v4332_v23 }
  0xe6   : > { %706 = vperm.xlu1 %3090, %v3232_v9   ;;  %v296_v13 = vpop.permute.xlu0 %295 }
  0xe7   : > { %v447_v60 = vmul.f32 %v3498_v28, %v296_v13 }
  0xe9   : > { %v631_v56 = vadd.f32 %v601_v5, %v447_v60  ;;  %v3514_v44 = vpop.permute.xlu1 %510 }
  0xea   : > { %750 = vperm.xlu1 %3090, %v3350_v30   ;;  %v3517_v32 = vpop.permute.xlu0 %300 }
  0xeb   : > { %v815_v23 = vadd.f32 %v785_v16, %v631_v56 }
  0xed   : > { %v999_v22 = vadd.f32 %v969_v18, %v815_v23 }
  0xee   : > { %758 = vperm.xlu1 %3090, %v3256_v15   ;;  %v671_v13 = vpop.permute.xlu1 %670  ;;  %v3526_v2 = vpop.permute.xlu0 %315 }
  0xef   : > { %v1034_v60 = vadd.f32 %v3523_v49, %v999_v22  ;;  %v611_v22 = vmul.f32 %v3491_v24, %v3404_v47  ;;  %v1708_v47 = vld [vmem:[%s4322_s3] sm:$0xff] }
  0xf1   : > { %v1064_v5 = vmax.f32 %v1034_v60, 0.0 }
  0xf2   : > { %3091 = vset.pattern.permute.xlu1 %v4351_v25  ;;  %v3530_v46 = vpop.permute.xlu1 %682  ;;  %v326_v14 = vpop.permute.xlu0 %325 }
  0xf3   : > { %1094 = vst [vmem:[#allocation2] sm:$0xff] %v1064_v5  ;;  %874 = vperm.xlu1 %3091, %v3219_v6   ;;  %v453_v56 = vmul.f32 %v3498_v28, %v326_v14  ;;  %v790_v48 = vmul.f32 %v3504_v0, %v3530_v46  ;;  %v1717_v46 = vld [vmem:[%s4322_s3 + $0x48] sm:$0xff] }
  0xf6   : > { %v3534_v16 = vpop.permute.xlu0 %335 }
  0xf7   : > { %894 = vperm.xlu1 %3091, %v3330_v27   ;;  %v503_v23 = vpop.permute.xlu1 %502  ;;  %v4354_v27 = vmov 1  }
  0xf8   : > { %v607_v18 = vmul.f32 %v3491_v24, %v503_v23 }
  0xfa   : > { %v3540_v60 = vadd.f32 %v607_v18, %v453_v56  ;;  %v346_v39 = vpop.permute.xlu0 %345  ;;  %v1709_v56 = vld [vmem:[%s4322_s3 + $0x8] sm:$0xff]  ;;  %v450_v18 = vmul.f32 %v3498_v28, %v3361_v33  ;;  %v972_v33 = vmul.f32 %v3510_v19, %v3441_v59  ;;  %v603_v59 = vmul.f32 %v3491_v24, %v3465_v4  ;;  %v1714_v4 = vld [vmem:[%s4322_s3 + $0x30] sm:$0xff] }
  0xfb   : > { %v457_v10 = vmul.f32 %v3498_v28, %v346_v39  ;;  %898 = vperm.xlu1 %3091, %v3240_v11   ;;  %v3544_v6 = vpop.permute.xlu1 %546  ;;  %v2999_v11 = vpack.c.bf16 %v1709_v56, %v1708_v47  ;;  %v604_v39 = vmul.f32 %v3491_v24, %v3372_v37  ;;  %v1711_v37 = vld [vmem:[%s4322_s3 + $0x18] sm:$0xff]  ;;  %v4356_v47 = vmov 2  }
  0xfc   : > { %4352 = vst [vmem:[#allocation15_spill] sm:$0xff] %v3540_v60  ;;  %4353 = vst [vmem:[#allocation16_spill] sm:$0xff] %v3544_v6  ;;  %v1712_v6 = vld [vmem:[%s4322_s3 + $0x20] sm:$0xff] }
  0xfd   : > { %v3546_v5 = vadd.f32 %v611_v22, %v457_v10  ;;  %v4337_v10 = vmov 0.0|0.0   ;;  %v1710_v22 = vld [vmem:[%s4322_s3 + $0x10] sm:$0xff] }
  0xfe   : > { %v3548_v14 = vpop.permute.xlu0 %355  ;;  %2998 = vmatprep.subr.bf16.mxu0 %v4337_v10  ;;  %3022 = vmatprep.subr.bf16.mxu1 %v4337_v10 }
  0xff   : > { %3093 = vset.pattern.permute.xlu1 %v4354_v27  ;;  %v559_v20 = vpop.permute.xlu1 %558  ;;  %3000 = vmatpush3.bf16.msra.mxu0 %v2999_v11 }
 0x100   : > { %582 = vperm.xlu1 %3093, %v3366_v35   ;;  %3030 = vmatpush3.bf16.msra.mxu1 %v2999_v11  ;;  %v634_v11 = vadd.f32 %v604_v39, %v450_v18  ;;  %v1713_v39 = vld [vmem:[%s4322_s3 + $0x28] sm:$0xff] }
 0x101   : > { %3001 = vmatprep.subr.bf16.mxu0 %v4337_v10  ;;  %3023 = vmatprep.subr.bf16.mxu1 %v4337_v10 }
 0x102   : > { %v3562_v23 = vpop.permute.xlu0 %365 }
 0x103   : > { %4355 = vst [vmem:[#allocation17_spill] sm:$0xff] %v3562_v23  ;;  %v3002_v23 = vpack.c.bf16 %v1711_v37, %v1710_v22  ;;  %v3005_v22 = vpack.c.bf16 %v1713_v39, %v1712_v6  ;;  %v787_v37 = vmul.f32 %v3504_v0, %v671_v13  ;;  %v452_v13 = vmul.f32 %v3498_v28, %v3370_v36 }
 0x104   : > { %3094 = vset.pattern.permute.xlu1 %v4356_v47  ;;  %v675_v56 = vpop.permute.xlu1 %674 }
 0x105   : > { %v788_v60 = vmul.f32 %v3504_v0, %v675_v56  ;;  %718 = vperm.xlu1 %3094, %v3338_v29   ;;  %3003 = vmatpush3.bf16.msra.mxu0 %v3002_v23 }
 0x106   : > { %v3579_v12 = vpop.permute.xlu0 %375  ;;  %3031 = vmatpush3.bf16.msra.mxu1 %v3002_v23  ;;  %3004 = vmatprep.subr.bf16.mxu0 %v4337_v10 }
 0x107   : > { %v818_v50 = vadd.f32 %v788_v60, %v634_v11  ;;  %3024 = vmatprep.subr.bf16.mxu1 %v4337_v10  ;;  %v449_v60 = vmul.f32 %v3498_v28, %v3354_v31  ;;  %v606_v31 = vmul.f32 %v3491_v24, %v3363_v34  ;;  %v621_v34 = vmul.f32 %v3491_v24, %v559_v20 }
 0x108   : > { %v3591_v18 = vpop.permute.xlu1 %698 }
 0x109   : > { %v1002_v23 = vadd.f32 %v972_v33, %v818_v50  ;;  %754 = vperm.xlu1 %3094, %v3268_v17   ;;  %3006 = vmatpush3.bf16.msra.mxu0 %v3005_v22  ;;  %v1715_v50 = vld [vmem:[%s4322_s3 + $0x38] sm:$0xff]  ;;  %v633_v6 = vadd.f32 %v603_v59, %v449_v60  ;;  %v4357_v59 = vmov 0.0|0.0   ;;  %v1716_v60 = vld [vmem:[%s4322_s3 + $0x40] sm:$0xff] }
 0x10a   : > { %v3597_v56 = vpop.permute.xlu0 %385  ;;  %3032 = vmatpush3.bf16.msra.mxu1 %v3005_v22  ;;  %3007 = vmatprep.subr.bf16.mxu0 %v4337_v10  ;;  %v3008_v33 = vpack.c.bf16 %v1715_v50, %v1714_v4 }
 0x10b   : > { %v1037_v11 = vadd.f32 %v3523_v49, %v1002_v23  ;;  %3025 = vmatprep.subr.bf16.mxu1 %v4337_v10  ;;  %v817_v23 = vadd.f32 %v787_v37, %v633_v6  ;;  %v636_v37 = vadd.f32 %v606_v31, %v452_v13  ;;  %v1719_v31 = vld [vmem:[%s4322_s3 + $0x58] sm:$0xff] }
 0x10d   : > { %v1067_v39 = vmax.f32 %v1037_v11, 0.0  ;;  %3095 = vset.pattern.permute.xlu1 %v4351_v25  ;;  %v855_v22 = vpop.permute.xlu1 %854  ;;  %3009 = vmatpush3.bf16.msra.mxu0 %v3008_v33  ;;  %v3011_v11 = vpack.c.bf16 %v1717_v46, %v1716_v60  ;;  %v1720_v60 = vld [vmem:[%s4322_s3 + $0x60] sm:$0xff]  ;;  %v1721_v46 = vld [vmem:[%s4322_s3 + $0x68] sm:$0xff] }
 0x10e   : > { %v971_v55 = vmul.f32 %v3510_v19, %v855_v22  ;;  %890 = vperm.xlu1 %3095, %v3232_v9   ;;  %v396_v10 = vpop.permute.xlu0 %395  ;;  %3010 = vmatprep.subr.bf16.mxu0 %v4357_v59 }
 0x10f   : > { %1097 = vst [vmem:[#allocation2 + $0x18] sm:$0xff] %v1067_v39  ;;  %v467_v36 = vmul.f32 %v3498_v28, %v396_v10  ;;  %3033 = vmatpush3.bf16.msra.mxu1 %v3008_v33  ;;  %v820_v10 = vadd.f32 %v790_v48, %v636_v37  ;;  %v3017_v37 = vpack.c.bf16 %v1721_v46, %v1720_v60 }
 0x110   : > { %v1001_v9 = vadd.f32 %v971_v55, %v817_v23  ;;  %3026 = vmatprep.subr.bf16.mxu1 %v4357_v59  ;;  %v1718_v55 = vld [vmem:[%s4322_s3 + $0x50] sm:$0xff]  ;;  %v622_v60 = vmul.f32 %v3491_v24, %v3398_v45  ;;  %v468_v46 = vmul.f32 %v3498_v28, %v3426_v54  ;;  %v605_v45 = vmul.f32 %v3491_v24, %v3472_v8 }
 0x111   : > { %v3627_v20 = vadd.f32 %v621_v34, %v467_v36  ;;  %v867_v4 = vpop.permute.xlu1 %866  ;;  %3012 = vmatpush3.bf16.msra.mxu0 %v3011_v11  ;;  %v3014_v33 = vpack.c.bf16 %v1719_v31, %v1718_v55  ;;  %v625_v34 = vmul.f32 %v3491_v24, %v3416_v51  ;;  %v459_v51 = vmul.f32 %v3498_v28, %v3548_v14  ;;  %v1723_v14 = vld [vmem:[%s4322_s3 + $0x78] sm:$0xff] }
 0x112   : > { %v1036_v50 = vadd.f32 %v3523_v49, %v1001_v9  ;;  %v974_v6 = vmul.f32 %v3510_v19, %v867_v4  ;;  %934 = vperm.xlu1 %3095, %v3350_v30   ;;  %v3632_v39 = vpop.permute.xlu0 %405  ;;  %3013 = vmatprep.subr.bf16.mxu0 %v4357_v59  ;;  %v652_v54 = vadd.f32 %v622_v60, %v468_v46 }
 0x113   : > { %3034 = vmatpush3.bf16.msra.mxu1 %v3011_v11  ;;  %v456_v60 = vmul.f32 %v3498_v28, %v3388_v42 }
 0x114   : > { %v1066_v48 = vmax.f32 %v1036_v50, 0.0  ;;  %v1004_v13 = vadd.f32 %v974_v6, %v820_v10  ;;  %3027 = vmatprep.subr.bf16.mxu1 %v4357_v59  ;;  %v1722_v50 = vld [vmem:[%s4322_s3 + $0x70] sm:$0xff] }
 0x115   : > { %3015 = vmatpush3.bf16.msra.mxu0 %v3014_v33  ;;  %v3020_v6 = vpack.c.bf16 %v1723_v14, %v1722_v50 }
 0x116   : > { %1096 = vst [vmem:[#allocation2 + $0x10] sm:$0xff] %v1066_v48  ;;  %v1039_v30 = vadd.f32 %v3523_v49, %v1004_v13  ;;  %942 = vperm.xlu1 %3095, %v3256_v15   ;;  %v3644_v22 = vpop.permute.xlu1 %506  ;;  %v416_v23 = vpop.permute.xlu0 %415  ;;  %3016 = vmatprep.subr.bf16.mxu0 %v4357_v59  ;;  %v617_v13 = vmul.f32 %v3491_v24, %v3391_v43 }
 0x117   : > { %v471_v36 = vmul.f32 %v3498_v28, %v416_v23  ;;  %3035 = vmatpush3.bf16.msra.mxu1 %v3014_v33  ;;  %v463_v33 = vmul.f32 %v3498_v28, %v3579_v12  ;;  %v985_v43 = vmul.f32 %v3510_v19, %v3448_v61  ;;  %v448_v12 = vmul.f32 %v3498_v28, %v3517_v32 }
 0x118   : > { %v1069_v15 = vmax.f32 %v1039_v30, 0.0  ;;  %3028 = vmatprep.subr.bf16.mxu1 %v4357_v59  ;;  %v3140_v30 = vmov 0.0   ;;  %v451_v32 = vmul.f32 %v3498_v28, %v3526_v2  ;;  %v973_v2 = vmul.f32 %v3510_v19, %v3435_v57 }
 0x119   : > { %v3659_v9 = vadd.f32 %v625_v34, %v471_v36  ;;  %3018 = vmatpush3.bf16.msra.mxu0 %v3017_v37  ;;  %2977 = vmatprep.mubr.msk.f32.mxu0 %vm3139_vm0, %v3140_v30  ;;  %v647_v34 = vadd.f32 %v617_v13, %v463_v33  ;;  %v455_v33 = vmul.f32 %v3498_v28, %v3534_v16 }
 0x11a   : > { %1099 = vst [vmem:[#allocation2 + $0x28] sm:$0xff] %v1069_v15  ;;  %3096 = vset.pattern.permute.xlu1 %v4354_v27  ;;  %v527_v11 = vpop.permute.xlu1 %526  ;;  %v3662_v4 = vpop.permute.xlu0 %425  ;;  %3019 = vmatprep.subr.bf16.mxu0 %v4357_v59  ;;  %v602_v15 = vmul.f32 %v3491_v24, %v3452_v62  ;;  %v970_v62 = vmul.f32 %v3510_v19, %v3494_v26 }
 0x11b   : > { %v613_v10 = vmul.f32 %v3491_v24, %v527_v11  ;;  %586 = vperm.xlu1 %3096, %v3282_v21   ;;  %3036 = vmatpush3.bf16.msra.mxu1 %v3017_v37  ;;  %v635_v13 = vadd.f32 %v605_v45, %v451_v32  ;;  %v610_v16 = vmul.f32 %v3491_v24, %v3381_v40 }
 0x11c   : > { %3029 = vmatprep.subr.bf16.mxu1 %v4357_v59  ;;  %2989 = vmatprep.mubr.msk.f32.mxu1 %vm3139_vm0, %v3140_v30  ;;  %v632_v11 = vadd.f32 %v602_v15, %v448_v12 }
 0x11d   : > { %v3673_v55 = vadd.f32 %v613_v10, %v459_v51  ;;  %3021 = vmatpush3.bf16.msra.mxu0 %v3020_v6  ;;  %v640_v42 = vadd.f32 %v610_v16, %v456_v60  ;;  %v465_v16 = vmul.f32 %v3498_v28, %v3597_v56  ;;  %v987_v56 = vmul.f32 %v3510_v19, %v3463_v3 }
 0x11e   : > { %v3676_v31 = vpop.permute.xlu1 %530  ;;  %v3678_v48 = vpop.permute.xlu0 %435  ;;  %v979_v3 = vmul.f32 %v3510_v19, %v3459_v1 }
 0x11f   : > { %3097 = vset.pattern.permute.xlu1 %v4356_v47  ;;  %3037 = vmatpush3.bf16.msra.mxu1 %v3020_v6  ;;  %v990_v6 = vmul.f32 %v3510_v19, %v3454_v63 }
 0x120   : > { %766 = vperm.xlu1 %3097, %v3366_v35  }
 0x122   : > { %v3690_v59 = vpop.permute.xlu0 %440 }
 0x123   : > { %v727_v23 = vpop.permute.xlu1 %726 }
 0x124   : > { %v801_v36 = vmul.f32 %v3504_v0, %v727_v23  ;;  %3098 = vset.pattern.permute.xlu1 %v4351_v25 }
 0x125   : > { %902 = vperm.xlu1 %3098, %v3338_v29  }
 0x126   : > { %v831_v61 = vadd.f32 %v801_v36, %v647_v34  ;;  %v609_v34 = vmul.f32 %v3491_v24, %v3514_v44 }
 0x127   : > { %v3707_v37 = vpop.permute.xlu1 %730  ;;  %v667_v51 = vpop.permute.xlu0 %666 }
 0x128   : > { %v1015_v10 = vadd.f32 %v985_v43, %v831_v61  ;;  %v786_v29 = vmul.f32 %v3504_v0, %v667_v51  ;;  %v639_v46 = vadd.f32 %v609_v34, %v455_v33  ;;  %v469_v34 = vmul.f32 %v3498_v28, %v3632_v39 }
 0x129   : > { %938 = vperm.xlu1 %3098, %v3268_v17  }
 0x12a   : > { %v1050_v50 = vadd.f32 %v3523_v49, %v1015_v10  ;;  %v816_v14 = vadd.f32 %v786_v29, %v632_v11  ;;  %v794_v10 = vmul.f32 %v3504_v0, %v3591_v18 }
 0x12b   : > { %v747_v8 = vpop.permute.xlu1 %746  ;;  %v679_v23 = vpop.permute.xlu0 %678 }
 0x12c   : > { %v1080_v17 = vmax.f32 %v1050_v50, 0.0  ;;  %v1000_v43 = vadd.f32 %v970_v62, %v816_v14  ;;  %v806_v12 = vmul.f32 %v3504_v0, %v747_v8  ;;  %v789_v26 = vmul.f32 %v3504_v0, %v679_v23 }
 0x12d   : > { %3099 = vset.pattern.permute.xlu1 %v4356_v47 }
 0x12e   : > { %1110 = vst [vmem:[#allocation2 + $0x80] sm:$0xff] %v1080_v17  ;;  %v1035_v57 = vadd.f32 %v3523_v49, %v1000_v43  ;;  %v836_v63 = vadd.f32 %v806_v12, %v652_v54  ;;  %v819_v36 = vadd.f32 %v789_v26, %v635_v13  ;;  %770 = vperm.xlu1 %3099, %v3282_v21  }
 0x12f   : > { %v695_v15 = vpop.permute.xlu0 %694  ;;  %v824_v13 = vadd.f32 %v794_v10, %v640_v42 }
 0x130   : > { %v1065_v61 = vmax.f32 %v1035_v57, 0.0  ;;  %v1020_v32 = vadd.f32 %v990_v6, %v836_v63  ;;  %v1003_v44 = vadd.f32 %v973_v2, %v819_v36  ;;  %v793_v51 = vmul.f32 %v3504_v0, %v695_v15  ;;  %v879_v11 = vpop.permute.xlu1 %878 }
 0x131   : > { %v977_v29 = vmul.f32 %v3510_v19, %v879_v11 }
 0x132   : > { %1095 = vst [vmem:[#allocation2 + $0x8] sm:$0xff] %v1065_v61  ;;  %v1055_v45 = vadd.f32 %v3523_v49, %v1020_v32  ;;  %v1038_v40 = vadd.f32 %v3523_v49, %v1003_v44  ;;  %v823_v54 = vadd.f32 %v793_v51, %v639_v46  ;;  %3101 = vset.pattern.permute.xlu1 %v4351_v25 }
 0x133   : > { %950 = vperm.xlu1 %3101, %v3366_v35   ;;  %v687_v62 = vpop.permute.xlu0 %686  ;;  %v472_v44 = vmul.f32 %v3498_v28, %v3438_v58 }
 0x134   : > { %v1085_v50 = vmax.f32 %v1055_v45, 0.0  ;;  %v1068_v14 = vmax.f32 %v1038_v40, 0.0  ;;  %v1007_v2 = vadd.f32 %v977_v29, %v823_v54  ;;  %v883_v6 = vpop.permute.xlu1 %882  ;;  %v620_v45 = vmul.f32 %v3491_v24, %v3422_v53 }
 0x135   : > { %v978_v18 = vmul.f32 %v3510_v19, %v883_v6 }
 0x136   : > { %1115 = vst [vmem:[#allocation2 + $0xa8] sm:$0xff] %v1085_v50  ;;  %1098 = vst [vmem:[#allocation2 + $0x20] sm:$0xff] %v1068_v14  ;;  %v1042_v33 = vadd.f32 %v3523_v49, %v1007_v2  ;;  %v4358_v14 = vld [vmem:[#allocation9_spill] sm:$0xff]  ;;  %v791_v2 = vmul.f32 %v3504_v0, %v687_v62  ;;  %v4361_v62 = vld [vmem:[#allocation8_spill] sm:$0xff] }
 0x137   : > { %v1008_v8 = vadd.f32 %v978_v18, %v824_v13  ;;  %3102 = vset.pattern.permute.xlu1 %v4354_v27  ;;  %v3744_v23 = vpop.permute.xlu0 %742  ;;  %v616_v53 = vmul.f32 %v3491_v24, %v4358_v14  ;;  %v4365_v14 = vld [vmem:[#allocation12_spill] sm:$0xff] }
 0x138   : > { %v1072_v17 = vmax.f32 %v1042_v33, 0.0  ;;  %590 = vperm.xlu1 %3102, %v3375_v38  }
 0x139   : > { %v1043_v35 = vadd.f32 %v3523_v49, %v1008_v8  ;;  %v551_v43 = vpop.permute.xlu1 %550 }
 0x13a   : > { %1102 = vst [vmem:[#allocation2 + $0x40] sm:$0xff] %v1072_v17  ;;  %v619_v60 = vmul.f32 %v3491_v24, %v551_v43  ;;  %v4360_v17 = vld [vmem:[#allocation16_spill] sm:$0xff] }
 0x13b   : > { %v1073_v12 = vmax.f32 %v1043_v35, 0.0  ;;  %v3748_v26 = vpop.permute.xlu0 %690  ;;  %v618_v35 = vmul.f32 %v3491_v24, %v4360_v17 }
 0x13c   : > { %3103 = vset.pattern.permute.xlu1 %v4351_v25  ;;  %v649_v61 = vadd.f32 %v619_v60, %v465_v16  ;;  %v4363_v60 = vld [vmem:[#allocation15_spill] sm:$0xff] }
 0x13d   : > { %1103 = vst [vmem:[#allocation2 + $0x48] sm:$0xff] %v1073_v12  ;;  %954 = vperm.xlu1 %3103, %v3282_v21   ;;  %v567_v57 = vpop.permute.xlu1 %566  ;;  %v464_v12 = vmul.f32 %v3498_v28, %v4361_v62 }
 0x13e   : > { %v623_v63 = vmul.f32 %v3491_v24, %v567_v57 }
 0x13f   : > { %v3755_v36 = vpop.permute.xlu0 %714 }
 0x140   : > { %v3760_v46 = vadd.f32 %v623_v63, %v469_v34 }
 0x141   : > { %3105 = vset.pattern.permute.xlu1 %v4354_v27  ;;  %v579_v39 = vpop.permute.xlu1 %578  ;;  %v466_v27 = vmul.f32 %v3498_v28, %v3419_v52  ;;  %v994_v52 = vmul.f32 %v3510_v19, %v3469_v7  ;;  %v4359_v7 = vld [vmem:[#allocation6_spill] sm:$0xff] }
 0x142   : > { %594 = vperm.xlu1 %3105, %v3384_v41   ;;  %v626_v21 = vmul.f32 %v3491_v24, %v579_v39  ;;  %v462_v8 = vmul.f32 %v3498_v28, %v4359_v7  ;;  %v821_v39 = vadd.f32 %v791_v2, %v4363_v60 }
 0x143   : > { %v735_v15 = vpop.permute.xlu0 %734  ;;  %v650_v1 = vadd.f32 %v620_v45, %v466_v27  ;;  %v4364_v27 = vld [vmem:[#allocation14_spill] sm:$0xff] }
 0x144   : > { %v803_v32 = vmul.f32 %v3504_v0, %v735_v15  ;;  %v656_v40 = vadd.f32 %v626_v21, %v472_v44  ;;  %v646_v16 = vadd.f32 %v616_v53, %v462_v8  ;;  %v4366_v53 = vsub.s32 0, %v4365_v14  ;;  %v1126_v8 = vld [vmem:[#allocation2] sm:$0x7f] }
 0x146   : > { %v833_v51 = vadd.f32 %v803_v32, %v649_v61  ;;  %3106 = vset.pattern.permute.xlu1 %v4356_v47  ;;  %v703_v11 = vpop.permute.xlu1 %702 }
 0x147   : > { %v795_v10 = vmul.f32 %v3504_v0, %v703_v11  ;;  %778 = vperm.xlu1 %3106, %v3384_v41   ;;  %v763_v29 = vpop.permute.xlu0 %762  ;;  %v648_v11 = vadd.f32 %v618_v35, %v464_v12 }
 0x148   : > { %v1017_v58 = vadd.f32 %v987_v56, %v833_v51  ;;  %v810_v54 = vmul.f32 %v3504_v0, %v763_v29 }
 0x149   : > { %v825_v47 = vadd.f32 %v795_v10, %v3546_v5  ;;  %v984_v10 = vmul.f32 %v3510_v19, %v4364_v27  ;;  %v1195_v27 = vld [vmem:[#allocation2 + $0x10] sm:$0x7f] }
 0x14a   : > { %v1052_v42 = vadd.f32 %v3523_v49, %v1017_v58  ;;  %v840_v50 = vadd.f32 %v810_v54, %v656_v40  ;;  %v3784_v41 = vpop.permute.xlu1 %710  ;;  %v3813_v40 = vld [vmem:[%s4321_s2] sm:$0xff]  ;;  %v805_v54 = vmul.f32 %v3504_v0, %v3744_v23  ;;  %v4367_v23 = vsub.s32 1, %v4365_v14 }
 0x14b   : > { %v1009_v6 = vadd.f32 %v979_v3, %v825_v47  ;;  %3107 = vset.pattern.permute.xlu1 %v4351_v25  ;;  %v739_v13 = vpop.permute.xlu0 %738  ;;  %v4362_v25 = vld [vmem:[#allocation13_spill] sm:$0xff]  ;;  %v3822_v2 = vrot.slane %v3813_v40, %v4366_v53 }
 0x14c   : > { %v1082_v18 = vmax.f32 %v1052_v42, 0.0  ;;  %v1024_v5 = vadd.f32 %v994_v52, %v840_v50  ;;  %v804_v33 = vmul.f32 %v3504_v0, %v739_v13  ;;  %958 = vperm.xlu1 %3107, %v3375_v38   ;;  %v988_v34 = vmul.f32 %v3510_v19, %v4362_v25 }
 0x14d   : > { %v1044_v43 = vadd.f32 %v3523_v49, %v1009_v6  ;;  %v802_v38 = vmul.f32 %v3504_v0, %v3707_v37  ;;  %v1144_v6 = vld [vmem:[#allocation2 + $0x8] sm:$0x7f] }
 0x14e   : > { %1112 = vst [vmem:[#allocation2 + $0x90] sm:$0xff] %v1082_v18  ;;  %v1059_v57 = vadd.f32 %v3523_v49, %v1024_v5  ;;  %v834_v63 = vadd.f32 %v804_v33, %v650_v1  ;;  %v3828_v5 = vrot.slane %v3813_v40, %v4367_v23  ;;  %v835_v33 = vadd.f32 %v805_v54, %v3627_v20  ;;  %v1169_v20 = vld [vmem:[#allocation2 + $0x1] sm:$0x7f]  ;;  %v1220_v54 = vld [vmem:[#allocation2 + $0x18] sm:$0x7f] }
 0x14f   : > { %v1074_v15 = vmax.f32 %v1044_v43, 0.0  ;;  %v871_v61 = vpop.permute.xlu1 %870  ;;  %v723_v21 = vpop.permute.xlu0 %722  ;;  %v832_v58 = vadd.f32 %v802_v38, %v648_v11  ;;  %v1271_v23 = vld [vmem:[#allocation2 + $0x20] sm:$0x7f] }
 0x150   : > { %v1089_v32 = vmax.f32 %v1059_v57, 0.0  ;;  %v1018_v44 = vadd.f32 %v988_v34, %v834_v63  ;;  %v975_v56 = vmul.f32 %v3510_v19, %v871_v61  ;;  %v800_v51 = vmul.f32 %v3504_v0, %v723_v21 }
 0x151   : > { %1104 = vst [vmem:[#allocation2 + $0x50] sm:$0xff] %v1074_v15  ;;  %v1155_v62 = vmul.f32 %v3828_v5, %v1144_v6  ;;  %v1137_v34 = vmul.f32 %v3822_v2, %v1126_v8  ;;  %v4368_v57 = vsub.s32 2, %v4365_v14  ;;  %v1280_v6 = vsub.s32 6, %v4365_v14 }
 0x152   : > { %1119 = vst [vmem:[#allocation2 + $0xc8] sm:$0xff] %v1089_v32  ;;  %v1053_v29 = vadd.f32 %v3523_v49, %v1018_v44  ;;  %v1005_v37 = vadd.f32 %v975_v56, %v821_v39  ;;  %v830_v45 = vadd.f32 %v800_v51, %v646_v16  ;;  %v4369_v39 = vld [vmem:[#allocation17_spill] sm:$0xff]  ;;  %v4370_v44 = vsub.s32 3, %v4365_v14 }
 0x153   : > { %v915_v3 = vpop.permute.xlu1 %914  ;;  %v3838_v63 = vrot.slane %v3813_v40, %v4368_v57  ;;  %v1162_v60 = vadd.f32 %v1155_v62, %v1137_v34  ;;  %v461_v15 = vmul.f32 %v3498_v28, %v4369_v39  ;;  %v1229_v51 = vsub.s32 4, %v4365_v14  ;;  %v4371_v62 = vld [vmem:[#allocation3_spill] sm:$0xff]  ;;  %v1296_v34 = vld [vmem:[#allocation2 + $0x28] sm:$0x7f] }
 0x154   : > { %v1083_v47 = vmax.f32 %v1053_v29, 0.0  ;;  %v1040_v52 = vadd.f32 %v3523_v49, %v1005_v37  ;;  %v1014_v42 = vadd.f32 %v984_v10, %v830_v45  ;;  %v986_v50 = vmul.f32 %v3510_v19, %v915_v3 }
 0x155   : > { %v1180_v32 = vmul.f32 %v3838_v63, %v1169_v20  ;;  %v3848_v56 = vrot.slane %v3813_v40, %v4370_v44  ;;  %v3857_v45 = vrot.slane %v3813_v40, %v1229_v51  ;;  %v608_v8 = vmul.f32 %v3491_v24, %v3644_v22 }
 0x156   : > { %1113 = vst [vmem:[#allocation2 + $0x98] sm:$0xff] %v1083_v47  ;;  %v1070_v13 = vmax.f32 %v1040_v52, 0.0  ;;  %v1049_v1 = vadd.f32 %v3523_v49, %v1014_v42  ;;  %v1016_v18 = vadd.f32 %v986_v50, %v832_v58  ;;  %v1254_v58 = vsub.s32 5, %v4365_v14  ;;  %v1245_v50 = vld [vmem:[#allocation2 + $0x11] sm:$0x7f] }
 0x157   : > { %v927_v7 = vpop.permute.xlu1 %926  ;;  %v1187_v29 = vadd.f32 %v1180_v32, %v1162_v60  ;;  %v1206_v37 = vmul.f32 %v3848_v56, %v1195_v27  ;;  %v1231_v52 = vmul.f32 %v3857_v45, %v1220_v54  ;;  %v797_v60 = vmul.f32 %v3504_v0, %v3784_v41  ;;  %v4372_v32 = vld [vmem:[#allocation5_spill] sm:$0xff] }
 0x158   : > { %1100 = vst [vmem:[#allocation2 + $0x30] sm:$0xff] %v1070_v13  ;;  %v1079_v17 = vmax.f32 %v1049_v1, 0.0  ;;  %v1051_v35 = vadd.f32 %v3523_v49, %v1016_v18  ;;  %v989_v43 = vmul.f32 %v3510_v19, %v927_v7  ;;  %v3864_v42 = vrot.slane %v3813_v40, %v1254_v58  ;;  %v1127_v27 = vld [vmem:[#allocation2 + $0x20] sm:$0x7f] }
 0x159   : > { %v1213_v3 = vadd.f32 %v1206_v37, %v1187_v29  ;;  %v1305_v18 = vsub.s32 7, %v4365_v14  ;;  %v3872_v7 = vrot.slane %v3813_v40, %v1280_v6  ;;  %v460_v44 = vmul.f32 %v3498_v28, %v4372_v32 }
 0x15a   : > { %1109 = vst [vmem:[#allocation2 + $0x78] sm:$0xff] %v1079_v17  ;;  %v1081_v12 = vmax.f32 %v1051_v35, 0.0  ;;  %v1019_v25 = vadd.f32 %v989_v43, %v835_v33  ;;  %v1256_v1 = vmul.f32 %v3864_v42, %v1245_v50  ;;  %v798_v29 = vmul.f32 %v3504_v0, %v3755_v36 }
 0x15b   : > { %v1238_v53 = vadd.f32 %v1231_v52, %v1213_v3  ;;  %v1282_v35 = vmul.f32 %v3872_v7, %v1271_v23  ;;  %v3880_v43 = vrot.slane %v3813_v40, %v1305_v18  ;;  %v1321_v40 = vld [vmem:[#allocation2 + $0x21] sm:$0x7f]  ;;  %v827_v37 = vadd.f32 %v797_v60, %v3673_v55  ;;  %v1145_v52 = vld [vmem:[#allocation2 + $0x28] sm:$0x7f] }
 0x15c   : > { %1111 = vst [vmem:[#allocation2 + $0x88] sm:$0xff] %v1081_v12  ;;  %v1054_v16 = vadd.f32 %v3523_v49, %v1019_v25  ;;  %v535_v38 = vpop.permute.xlu1 %534  ;;  %v454_v12 = vmul.f32 %v3498_v28, %v4371_v62  ;;  %v792_v25 = vmul.f32 %v3504_v0, %v3748_v26  ;;  %v3895_v26 = vld [vmem:[%s4321_s2 + $0x8] ss:$0 sm:$0xff]  ;;  %v3141_v54 = vmov 1966171168  }
 0x15d   : > { %v615_v61 = vmul.f32 %v3491_v24, %v535_v38  ;;  %v1263_v33 = vadd.f32 %v1256_v1, %v1238_v53  ;;  %v1307_v38 = vmul.f32 %v3880_v43, %v1296_v34  ;;  %v1332_v41 = vmul.f32 %v3895_v26, %v1321_v40  ;;  %v3909_v23 = vld [vmem:[%s4323_s4 + $0x1] ss:$0 sm:$0xff] }
 0x15e   : > { %v1084_v21 = vmax.f32 %v1054_v16, 0.0  ;;  %v638_v20 = vadd.f32 %v608_v8, %v454_v12  ;;  %v1374_v3 = vunpack.c.l.s4 %v3141_v54  ;;  %v1138_v18 = vmul.f32 %v3822_v2, %v1127_v27  ;;  %v1170_v62 = vld [vmem:[#allocation2 + $0x21] sm:$0x7f] }
 0x15f   : > { %v3851_v11 = vadd.f32 %v615_v61, %v461_v15  ;;  %v1289_v57 = vadd.f32 %v1282_v35, %v1263_v33  ;;  %v614_v61 = vmul.f32 %v3491_v24, %v3676_v31  ;;  %v1156_v35 = vmul.f32 %v3828_v5, %v1145_v52  ;;  %v1196_v12 = vld [vmem:[#allocation2 + $0x30] sm:$0x7f] }
 0x160   : > { %1114 = vst [vmem:[#allocation2 + $0xa0] sm:$0xff] %v1084_v21  ;;  %v3853_v10 = vpop.permute.xlu1 %570  ;;  %v822_v22 = vadd.f32 %v792_v25, %v638_v20  ;;  %v1375_v34 = vunpack.c.0.s8 %v1374_v3  ;;  %v1181_v60 = vmul.f32 %v3838_v63, %v1170_v62 }
 0x161   : > { %v1314_v15 = vadd.f32 %v1307_v38, %v1289_v57  ;;  %v644_v53 = vadd.f32 %v614_v61, %v460_v44 }
 0x163   : > { %v1339_v50 = vadd.f32 %v1332_v41, %v1314_v15  ;;  %v828_v55 = vadd.f32 %v798_v29, %v644_v53  ;;  %v3921_v15 = vsub.s32 %v1375_v34, %v4365_v14  ;;  %v1148_v32 = vld [vmem:[#allocation2 + $0x88] sm:$0x7f]  ;;  %v1130_v29 = vld [vmem:[#allocation2 + $0x80] sm:$0x7f] }
 0x164   : > { %v1159_v54 = vmul.f32 %v3828_v5, %v1148_v32  ;;  %v1141_v53 = vmul.f32 %v3822_v2, %v1130_v29 }
 0x165   : > { %v3860_v47 = vpop.permute.xlu1 %706  ;;  %v1351_v25 = vadd.f32 %v3909_v23, %v1339_v50  ;;  %v1297_v50 = vld [vmem:[#allocation2 + $0x48] sm:$0x7f] }
 0x166   : > { %v1166_v62 = vadd.f32 %v1159_v54, %v1141_v53 }
 0x167   : > { %v1358_v40 = vmax.f32 %v1351_v25, 0.0  ;;  %v1308_v25 = vmul.f32 %v3880_v43, %v1297_v50 }
 0x169   : > { %v3867_v13 = vpop.permute.xlu1 %750  ;;  %v1379_v52 = vrot.slane %v1358_v40, %v3921_v15 }
 0x16a   : > { %v807_v29 = vmul.f32 %v3504_v0, %v3867_v13 }
 0x16b   : > { %v1387_v34 = vcombine.high %v1379_v52, %v1379_v52 }
 0x16d   : > { %v3876_v17 = vpop.permute.xlu1 %758 }
 0x172   : > { %v875_v16 = vpop.permute.xlu1 %874 }
 0x173   : > { %v976_v39 = vmul.f32 %v3510_v19, %v875_v16  ;;  %v1163_v16 = vadd.f32 %v1156_v35, %v1138_v18  ;;  %v1173_v18 = vld [vmem:[#allocation2 + $0x81] sm:$0x7f] }
 0x175   : > { %v1006_v21 = vadd.f32 %v976_v39, %v822_v22  ;;  %v1207_v39 = vmul.f32 %v3848_v56, %v1196_v12 }
 0x176   : > { %v895_v51 = vpop.permute.xlu1 %894 }
 0x177   : > { %v1041_v31 = vadd.f32 %v3523_v49, %v1006_v21  ;;  %v981_v58 = vmul.f32 %v3510_v19, %v895_v51  ;;  %v1188_v21 = vadd.f32 %v1181_v60, %v1163_v16  ;;  %v1246_v51 = vld [vmem:[#allocation2 + $0x31] sm:$0x7f]  ;;  %v796_v16 = vmul.f32 %v3504_v0, %v3860_v47 }
 0x178   : > { %v1257_v14 = vmul.f32 %v3864_v42, %v1246_v51 }
 0x179   : > { %v1071_v6 = vmax.f32 %v1041_v31, 0.0  ;;  %v1011_v1 = vadd.f32 %v981_v58, %v827_v37  ;;  %v1214_v27 = vadd.f32 %v1207_v39, %v1188_v21  ;;  %v1272_v31 = vld [vmem:[#allocation2 + $0x40] sm:$0x7f]  ;;  %v1372_v58 = vcombine.high %v1358_v40, %v1358_v40  ;;  %v1199_v40 = vld [vmem:[#allocation2 + $0x90] sm:$0x7f] }
 0x17a   : > { %v899_v36 = vpop.permute.xlu1 %898  ;;  %v1210_v47 = vmul.f32 %v3848_v56, %v1199_v40 }
 0x17b   : > { %1101 = vst [vmem:[#allocation2 + $0x38] sm:$0xff] %v1071_v6  ;;  %v1046_v33 = vadd.f32 %v3523_v49, %v1011_v1  ;;  %v982_v8 = vmul.f32 %v3510_v19, %v899_v36  ;;  %v1283_v1 = vmul.f32 %v3872_v7, %v1272_v31  ;;  %v4373_v36 = vld [vmem:[#allocation7_spill] sm:$0xff]  ;;  %v1386_v35 = vrot.slane %v1372_v58, %v3921_v15  ;;  %v1224_v58 = vld [vmem:[#allocation2 + $0x98] sm:$0x7f] }
 0x17d   : > { %v1076_v57 = vmax.f32 %v1046_v33, 0.0  ;;  %v1012_v20 = vadd.f32 %v982_v8, %v828_v55  ;;  %v612_v55 = vmul.f32 %v3491_v24, %v4373_v36  ;;  %v1322_v8 = vld [vmem:[#allocation2 + $0x41] sm:$0x7f]  ;;  %v1388_v21 = vcombine.high %v1386_v35, %v1386_v35 }
 0x17e   : > { %v1333_v39 = vmul.f32 %v3895_v26, %v1322_v8  ;;  %v1402_v50 = vrot.slane %v1386_v35, %v3921_v15 }
 0x17f   : > { %1106 = vst [vmem:[#allocation2 + $0x60] sm:$0xff] %v1076_v57  ;;  %v1047_v38 = vadd.f32 %v3523_v49, %v1012_v20  ;;  %v3916_v22 = vpop.permute.xlu1 %582  ;;  %v4374_v57 = vld [vmem:[#allocation4_spill] sm:$0xff]  ;;  %v1416_v53 = vrot.slane %v1388_v21, %v3921_v15 }
 0x180   : > { %v458_v20 = vmul.f32 %v3498_v28, %v4374_v57 }
 0x181   : > { %v1077_v61 = vmax.f32 %v1047_v38, 0.0  ;;  %v1184_v38 = vmul.f32 %v3838_v63, %v1173_v18 }
 0x182   : > { %v1221_v44 = vld [vmem:[#allocation2 + $0x38] sm:$0x7f] }
 0x183   : > { %1107 = vst [vmem:[#allocation2 + $0x68] sm:$0xff] %v1077_v61  ;;  %v1232_v41 = vmul.f32 %v3857_v45, %v1221_v44  ;;  %v642_v61 = vadd.f32 %v612_v55, %v458_v20  ;;  %v1191_v32 = vadd.f32 %v1184_v38, %v1166_v62  ;;  %v1235_v62 = vmul.f32 %v3857_v45, %v1224_v58  ;;  %v1275_v58 = vld [vmem:[#allocation2 + $0xa0] sm:$0x7f] }
 0x184   : > { %v3924_v37 = vpop.permute.xlu1 %718 }
 0x185   : > { %v1239_v3 = vadd.f32 %v1232_v41, %v1214_v27  ;;  %v1409_v27 = vrot.slane %v1387_v34, %v3921_v15  ;;  %v826_v41 = vadd.f32 %v796_v16, %v642_v61  ;;  %v1217_v18 = vadd.f32 %v1210_v47, %v1191_v32  ;;  %v1249_v16 = vld [vmem:[#allocation2 + $0x91] sm:$0x7f] }
 0x186   : > { %v1731_v61 = vcombine.low %v1402_v50, %v1416_v53  ;;  %v1197_v47 = vld [vmem:[#allocation2 + $0x50] sm:$0x7f] }
 0x187   : > { %v1264_v6 = vadd.f32 %v1257_v14, %v1239_v3  ;;  %v1395_v3 = vrot.slane %v1379_v52, %v3921_v15  ;;  %v809_v52 = vmul.f32 %v3504_v0, %v3876_v17 }
 0x188   : > { %v3933_v33 = vpop.permute.xlu1 %754  ;;  %v1753_v53 = vrot.slane %v1731_v61, %v3921_v15 }
 0x189   : > { %v1290_v12 = vadd.f32 %v1283_v1, %v1264_v6  ;;  %v1128_v6 = vld [vmem:[#allocation2 + $0x40] sm:$0x7f]  ;;  %v1146_v1 = vld [vmem:[#allocation2 + $0x48] sm:$0x7f]  ;;  %v1729_v13 = vcombine.low %v1395_v3, %v1409_v27  ;;  %v2910_v8 = vcombine.high %v1395_v3, %v1409_v27 }
 0x18a   : > { %v1139_v57 = vmul.f32 %v3822_v2, %v1128_v6  ;;  %v1157_v20 = vmul.f32 %v3828_v5, %v1146_v1 }
 0x18b   : > { %v1315_v60 = vadd.f32 %v1308_v25, %v1290_v12  ;;  %v837_v12 = vadd.f32 %v807_v29, %v3760_v46  ;;  %v1242_v46 = vadd.f32 %v1235_v62, %v1217_v18  ;;  %v1739_v21 = vrot.slane %v1729_v13, %v3921_v15 }
 0x18c   : > { %v1746_v32 = vrot.slane %v2910_v8, %v3921_v15  ;;  %v1208_v13 = vmul.f32 %v3848_v56, %v1197_v47  ;;  %v1286_v8 = vmul.f32 %v3872_v7, %v1275_v58 }
 0x18d   : > { %v891_v44 = vpop.permute.xlu1 %890  ;;  %v1340_v51 = vadd.f32 %v1333_v39, %v1315_v60  ;;  %v1418_v39 = vcombine.high %v1402_v50, %v1402_v50 }
 0x18e   : > { %v980_v31 = vmul.f32 %v3510_v19, %v891_v44  ;;  %v839_v44 = vadd.f32 %v809_v52, %v3659_v9  ;;  %v1761_v6 = vcombine.low %v1739_v21, %v1746_v32  ;;  %v1273_v21 = vld [vmem:[#allocation2 + $0x60] sm:$0x7f] }
 0x18f   : > { %v1352_v54 = vadd.f32 %v3909_v23, %v1340_v51  ;;  %v1325_v32 = vld [vmem:[#allocation2 + $0xa1] sm:$0x7f] }
 0x190   : > { %v1010_v14 = vadd.f32 %v980_v31, %v826_v41  ;;  %v1260_v41 = vmul.f32 %v3864_v42, %v1249_v16  ;;  %v1171_v31 = vld [vmem:[#allocation2 + $0x41] sm:$0x7f] }
 0x191   : > { %v935_v36 = vpop.permute.xlu1 %934  ;;  %v3952_v55 = vmax.f32 %v1352_v54, 0.0 }
 0x192   : > { %v1045_v25 = vadd.f32 %v3523_v49, %v1010_v14  ;;  %v991_v35 = vmul.f32 %v3510_v19, %v935_v36  ;;  %v1164_v14 = vadd.f32 %v1157_v20, %v1139_v57  ;;  %v1267_v50 = vadd.f32 %v1260_v41, %v1242_v46 }
 0x193   : > { %v3962_v34 = vrot.slane %v3952_v55, %v3921_v15  ;;  %v1182_v36 = vmul.f32 %v3838_v63, %v1171_v31  ;;  %v1769_v57 = vrot.slane %v1761_v6, %v3921_v15  ;;  %v624_v41 = vmul.f32 %v3491_v24, %v3853_v10  ;;  %v1298_v31 = vld [vmem:[#allocation2 + $0x68] sm:$0x7f] }
 0x194   : > { %v1075_v38 = vmax.f32 %v1045_v25, 0.0  ;;  %v1021_v60 = vadd.f32 %v991_v35, %v837_v12  ;;  %v1300_v12 = vld [vmem:[#allocation2 + $0xa8] sm:$0x7f]  ;;  %v1293_v35 = vadd.f32 %v1286_v8, %v1267_v50  ;;  %v1420_v47 = vcombine.high %v3952_v55, %v3952_v55 }
 0x195   : > { %v943_v40 = vpop.permute.xlu1 %942  ;;  %v3968_v17 = vrot.slane %v3962_v34, %v3921_v15  ;;  %v1189_v25 = vadd.f32 %v1182_v36, %v1164_v14  ;;  %v1311_v46 = vmul.f32 %v3880_v43, %v1300_v12  ;;  %v1336_v14 = vmul.f32 %v3895_v26, %v1325_v32  ;;  %v4375_v10 = vld [vmem:[#allocation10_spill] sm:$0xff] }
 0x196   : > { %1105 = vst [vmem:[#allocation2 + $0x58] sm:$0xff] %v1075_v38  ;;  %v1056_v51 = vadd.f32 %v3523_v49, %v1021_v60  ;;  %v993_v27 = vmul.f32 %v3510_v19, %v943_v40  ;;  %v3982_v49 = vld [vmem:[%s4323_s4] ss:$0 sm:$0xff]  ;;  %v1247_v38 = vld [vmem:[#allocation2 + $0x51] sm:$0x7f]  ;;  %v470_v50 = vmul.f32 %v3498_v28, %v4375_v10  ;;  %v1309_v6 = vmul.f32 %v3880_v43, %v1298_v31 }
 0x197   : > { %v1732_v29 = vcombine.low %v1418_v39, %v3968_v17  ;;  %v1215_v60 = vadd.f32 %v1208_v13, %v1189_v25  ;;  %v4376_v25 = vld [vmem:[#allocation11_spill] sm:$0xff] }
 0x198   : > { %v1086_v54 = vmax.f32 %v1056_v51, 0.0  ;;  %v1023_v3 = vadd.f32 %v993_v27, %v839_v44  ;;  %v1258_v51 = vmul.f32 %v3864_v42, %v1247_v38  ;;  %v1318_v27 = vadd.f32 %v1311_v46, %v1293_v35 }
 0x199   : > { %v1760_v9 = vrot.slane %v1732_v29, %v3921_v15  ;;  %v799_v29 = vmul.f32 %v3504_v0, %v3924_v37  ;;  %v1323_v37 = vld [vmem:[#allocation2 + $0x61] sm:$0x7f]  ;;  %v654_v8 = vadd.f32 %v624_v41, %v470_v50  ;;  %v1147_v41 = vld [vmem:[#allocation2 + $0x68] sm:$0x7f] }
 0x19a   : > { %1116 = vst [vmem:[#allocation2 + $0xb0] sm:$0xff] %v1086_v54  ;;  %v1058_v1 = vadd.f32 %v3982_v49, %v1023_v3  ;;  %v3985_v18 = vpop.permute.xlu1 %586  ;;  %v1284_v54 = vmul.f32 %v3872_v7, %v1273_v21  ;;  %v1435_v3 = vcombine.high %v3962_v34, %v3962_v34  ;;  %v1434_v34 = vrot.slane %v1420_v47, %v3921_v15  ;;  %v1274_v47 = vld [vmem:[#allocation2 + $0x80] sm:$0x7f] }
 0x19b   : > { %v1762_v62 = vcombine.low %v1753_v53, %v1760_v9  ;;  %v808_v53 = vmul.f32 %v3504_v0, %v3933_v33  ;;  %v829_v36 = vadd.f32 %v799_v29, %v3851_v11  ;;  %v1334_v12 = vmul.f32 %v3895_v26, %v1323_v37 }
 0x19c   : > { %v1088_v52 = vmax.f32 %v1058_v1, 0.0  ;;  %v1343_v1 = vadd.f32 %v1336_v14, %v1318_v27  ;;  %v4021_v33 = vmul.f32 %v3498_v28, %v4376_v25  ;;  %v1436_v21 = vcombine.high %v1434_v34, %v1434_v34 }
 0x19d   : > { %v1776_v20 = vrot.slane %v1762_v62, %v3921_v15  ;;  %v1222_v16 = vld [vmem:[#allocation2 + $0x58] sm:$0x7f]  ;;  %v1450_v32 = vrot.slane %v1434_v34, %v3921_v15 }
 0x19e   : > { %1118 = vst [vmem:[#allocation2 + $0xc0] sm:$0xff] %v1088_v52  ;;  %v1233_v39 = vmul.f32 %v3857_v45, %v1222_v16  ;;  %v1457_v52 = vrot.slane %v1435_v3, %v3921_v15  ;;  %v1355_v38 = vadd.f32 %v3909_v23, %v1343_v1  ;;  %v1174_v1 = vld [vmem:[#allocation2 + $0xa1] sm:$0x7f] }
 0x19f   : > { %v3994_v40 = vpop.permute.xlu1 %766  ;;  %v1777_v61 = vcombine.low %v1769_v57, %v1776_v20  ;;  %v473_v57 = vmul.f32 %v3498_v28, %v3662_v4  ;;  %v838_v20 = vadd.f32 %v808_v53, %v654_v8  ;;  %v4035_v4 = vmul.f32 %v3498_v28, %v3690_v59  ;;  %v1129_v59 = vld [vmem:[#allocation2 + $0x60] sm:$0x7f] }
 0x1a0   : > { %v1240_v44 = vadd.f32 %v1233_v39, %v1215_v60  ;;  %v1131_v60 = vld [vmem:[#allocation2 + $0xa0] sm:$0x7f]  ;;  %v1149_v39 = vld [vmem:[#allocation2 + $0xa8] sm:$0x7f]  ;;  %v1467_v27 = vcombine.high %v1457_v52, %v1457_v52  ;;  %v4044_v10 = vmax.f32 %v1355_v38, 0.0  ;;  %v1464_v53 = vrot.slane %v1436_v21, %v3921_v15 }
 0x1a1   : > { %2978 = vmatmul.mubr.f32.vlgmr.msra.gmra.mrb[0].mxu0 %v1777_v61  ;;  %v1160_v3 = vmul.f32 %v3828_v5, %v1149_v39  ;;  %v811_v34 = vmul.f32 %v3504_v0, %v3994_v40 }
 0x1a2   : > { %2980 = vmatprep.mubr.msk.f32.mxu0 %vm3139_vm0, %v3140_v30  ;;  %v1265_v58 = vadd.f32 %v1258_v51, %v1240_v44  ;;  %v4031_v44 = vmul.f32 %v3498_v28, %v3678_v48  ;;  %v627_v48 = vmul.f32 %v3491_v24, %v3916_v22  ;;  %v1465_v28 = vcombine.high %v3968_v17, %v3968_v17 }
 0x1a4   : > { %v903_v9 = vpop.permute.xlu1 %902  ;;  %v1291_v55 = vadd.f32 %v1284_v54, %v1265_v58  ;;  %v1324_v58 = vld [vmem:[#allocation2 + $0x81] sm:$0x7f]  ;;  %v1142_v54 = vmul.f32 %v3822_v2, %v1131_v60  ;;  %v657_v38 = vadd.f32 %v627_v48, %v473_v57  ;;  %v1564_v48 = vcombine.high %v4044_v10, %v4044_v10 }
 0x1a5   : > { %v983_v13 = vmul.f32 %v3510_v19, %v903_v9  ;;  %v1466_v9 = vcombine.high %v1450_v32, %v1450_v32  ;;  %v4054_v17 = vmul.f32 %v3895_v26, %v1324_v58 }
 0x1a6   : > { %v1316_v62 = vadd.f32 %v1309_v6, %v1291_v55  ;;  %v1158_v55 = vmul.f32 %v3828_v5, %v1147_v41  ;;  %v1223_v6 = vld [vmem:[#allocation2 + $0x78] sm:$0x7f] }
 0x1a7   : > { %v1013_v35 = vadd.f32 %v983_v13, %v829_v36  ;;  %v1779_v36 = vcombine.low %v1467_v27, %v1450_v32  ;;  %v4051_v13 = vmul.f32 %v3872_v7, %v1274_v47  ;;  %v1780_v60 = vcombine.low %v1464_v53, %v1466_v9 }
 0x1a8   : > { %v939_v11 = vpop.permute.xlu1 %938  ;;  %v1341_v16 = vadd.f32 %v1334_v12, %v1316_v62  ;;  %v1140_v62 = vmul.f32 %v3822_v2, %v1129_v59  ;;  %v1167_v12 = vadd.f32 %v1160_v3, %v1142_v54  ;;  %v841_v27 = vadd.f32 %v811_v34, %v657_v38  ;;  %v1299_v54 = vld [vmem:[#allocation2 + $0x88] sm:$0x7f] }
 0x1a9   : > { %v1048_v46 = vadd.f32 %v3982_v49, %v1013_v35  ;;  %v992_v61 = vmul.f32 %v3510_v19, %v939_v11  ;;  %v1778_v35 = vcombine.low %v1457_v52, %v1465_v28  ;;  %v1234_v11 = vmul.f32 %v3857_v45, %v1223_v6 }
 0x1aa   : > { %v1353_v51 = vadd.f32 %v3909_v23, %v1341_v16  ;;  %v1185_v16 = vmul.f32 %v3838_v63, %v1174_v1  ;;  %v1165_v39 = vadd.f32 %v1158_v55, %v1140_v62  ;;  %v1795_v52 = vrot.slane %v1779_v36, %v3921_v15 }
 0x1ab   : > { %v1078_v29 = vmax.f32 %v1048_v46, 0.0  ;;  %v1022_v31 = vadd.f32 %v992_v61, %v838_v20  ;;  %v1172_v20 = vld [vmem:[#allocation2 + $0x61] sm:$0x7f]  ;;  %v1571_v46 = vrot.slane %v4044_v10, %v3921_v15  ;;  %v1200_v61 = vld [vmem:[#allocation2 + $0xb0] sm:$0x7f]  ;;  %v1788_v47 = vrot.slane %v1778_v35, %v3921_v15 }
 0x1ac   : > { %v1360_v14 = vmax.f32 %v1353_v51, 0.0  ;;  %v1183_v41 = vmul.f32 %v3838_v63, %v1172_v20  ;;  %v1211_v3 = vmul.f32 %v3848_v56, %v1200_v61  ;;  %v1802_v53 = vrot.slane %v1780_v60, %v3921_v15  ;;  %v1250_v20 = vld [vmem:[#allocation2 + $0xb1] sm:$0x7f]  ;;  %v1276_v61 = vld [vmem:[#allocation2 + $0xc0] sm:$0x7f] }
 0x1ad   : > { %1108 = vst [vmem:[#allocation2 + $0x70] sm:$0xff] %v1078_v29  ;;  %v1057_v50 = vadd.f32 %v3982_v49, %v1022_v31  ;;  %v771_v37 = vpop.permute.xlu1 %770  ;;  %v1192_v29 = vadd.f32 %v1185_v16, %v1167_v12  ;;  %v1810_v55 = vcombine.low %v1788_v47, %v1795_v52  ;;  %v1578_v16 = vrot.slane %v1564_v48, %v3921_v15 }
 0x1ae   : > { %v1475_v22 = vrot.slane %v1360_v14, %v3921_v15  ;;  %v1468_v51 = vcombine.high %v1360_v14, %v1360_v14  ;;  %v1190_v14 = vadd.f32 %v1183_v41, %v1165_v39  ;;  %v812_v62 = vmul.f32 %v3504_v0, %v771_v37 }
 0x1af   : > { %v1087_v8 = vmax.f32 %v1057_v50, 0.0  ;;  %v1579_v50 = vcombine.high %v1571_v46, %v1571_v46  ;;  %v1580_v48 = vcombine.high %v1578_v16, %v1578_v16 }
 0x1b0   : > { %v1483_v25 = vcombine.high %v1475_v22, %v1475_v22  ;;  %v4064_v21 = vrot.slane %v1475_v22, %v3921_v15  ;;  %v1482_v1 = vrot.slane %v1468_v51, %v3921_v15  ;;  %v628_v22 = vmul.f32 %v3491_v24, %v3985_v18 }
 0x1b1   : > { %1117 = vst [vmem:[#allocation2 + $0xb8] sm:$0xff] %v1087_v8  ;;  %v1310_v8 = vmul.f32 %v3880_v43, %v1299_v54  ;;  %v1601_v37 = vrot.slane %v1579_v50, %v3921_v15  ;;  %v1587_v54 = vrot.slane %v1571_v46, %v3921_v15  ;;  %v1132_v50 = vld [vmem:[#allocation2 + $0xc0] sm:$0x7f]  ;;  %v4103_v46 = vrot.slane %v1578_v16, %v3921_v15 }
 0x1b2   : > { %v951_v40 = vpop.permute.xlu1 %950  ;;  %v4067_v32 = vrot.slane %v1483_v25, %v3921_v15  ;;  %v1218_v25 = vadd.f32 %v1211_v3, %v1192_v29  ;;  %v1484_v51 = vcombine.high %v1482_v1, %v1482_v1  ;;  %v1287_v3 = vmul.f32 %v3872_v7, %v1276_v61 }
 0x1b3   : > { %v995_v57 = vmul.f32 %v3510_v19, %v951_v40  ;;  %v1818_v40 = vrot.slane %v1810_v55, %v3921_v15 }
 0x1b4   : > { %v1781_v31 = vcombine.low %v4064_v21, %v4067_v32  ;;  %v1198_v58 = vld [vmem:[#allocation2 + $0x70] sm:$0x7f] }
 0x1b5   : > { %v1025_v28 = vadd.f32 %v995_v57, %v841_v27  ;;  %v1209_v59 = vmul.f32 %v3848_v56, %v1198_v58  ;;  %v1248_v6 = vld [vmem:[#allocation2 + $0x71] sm:$0x7f]  ;;  %v658_v27 = vadd.f32 %v628_v22, %v4021_v33  ;;  %v775_v57 = vpop.permute.xlu0 %774 }
 0x1b6   : > { %v1809_v9 = vrot.slane %v1781_v31, %v3921_v15  ;;  %v1259_v39 = vmul.f32 %v3864_v42, %v1248_v6  ;;  %v1301_v31 = vld [vmem:[#allocation2 + $0xc8] sm:$0x7f]  ;;  %v1326_v6 = vld [vmem:[#allocation2 + $0xc1] sm:$0x7f] }
 0x1b7   : > { %v1060_v36 = vadd.f32 %v3982_v49, %v1025_v28  ;;  %v591_v34 = vpop.permute.xlu1 %590  ;;  %v1216_v10 = vadd.f32 %v1209_v59, %v1190_v14  ;;  %v842_v28 = vadd.f32 %v812_v62, %v658_v27  ;;  %v1312_v55 = vmul.f32 %v3880_v43, %v1301_v31  ;;  %v1150_v62 = vld [vmem:[#allocation2 + $0xc8] sm:$0x7f] }
 0x1b8   : > { %v1811_v12 = vcombine.low %v1802_v53, %v1809_v9  ;;  %v1225_v35 = vld [vmem:[#allocation2 + $0xb8] sm:$0x7f]  ;;  %v813_v53 = vmul.f32 %v3504_v0, %v775_v57  ;;  %v1512_v9 = vrot.slane %v1484_v51, %v3921_v15  ;;  %v629_v61 = vmul.f32 %v3491_v24, %v591_v34  ;;  %v1175_v57 = vld [vmem:[#allocation2 + $0xc1] sm:$0x7f] }
 0x1b9   : > { %v1090_v38 = vmax.f32 %v1060_v36, 0.0  ;;  %v1241_v60 = vadd.f32 %v1234_v11, %v1216_v10  ;;  %v1236_v18 = vmul.f32 %v3857_v45, %v1225_v35  ;;  %v1261_v11 = vmul.f32 %v3864_v42, %v1250_v20 }
 0x1ba   : > { %v1825_v52 = vrot.slane %v1811_v12, %v3921_v15  ;;  %v1878_v10 = vcombine.low %v1587_v54, %v1601_v37  ;;  %v963_v12 = vpop.permute.xlu0 %962  ;;  %v2912_v35 = vcombine.high %v1587_v54, %v1601_v37  ;;  %v4109_v20 = vrot.slane %v1580_v48, %v3921_v15 }
 0x1bb   : > { %1120 = vst [vmem:[#allocation2 + $0xd0] sm:$0xff] %v1090_v38  ;;  %v1266_v41 = vadd.f32 %v1259_v39, %v1241_v60  ;;  %v1243_v29 = vadd.f32 %v1236_v18, %v1218_v25  ;;  %v1498_v25 = vrot.slane %v1482_v1, %v3921_v15  ;;  %v1143_v38 = vmul.f32 %v3822_v2, %v1132_v50 }
 0x1bc   : > { %v955_v47 = vpop.permute.xlu1 %954  ;;  %v1826_v58 = vcombine.low %v1818_v40, %v1825_v52  ;;  %v1161_v1 = vmul.f32 %v3828_v5, %v1150_v62  ;;  %v998_v37 = vmul.f32 %v3510_v19, %v963_v12  ;;  %v4126_v34 = vrot.slane %v2912_v35, %v3921_v15 }
 0x1bd   : > { %v996_v14 = vmul.f32 %v3510_v19, %v955_v47  ;;  %v1292_v59 = vadd.f32 %v4051_v13, %v1266_v41  ;;  %v1268_v33 = vadd.f32 %v1261_v11, %v1243_v29  ;;  %v1828_v52 = vcombine.low %v1498_v25, %v1512_v9 }
 0x1be   : > { %2981 = vmatmul.mubr.f32.gmra.mrb[2].mxu0 %v1826_v58  ;;  %v4123_v41 = vrot.slane %v1878_v10, %v3921_v15  ;;  %v1610_v11 = vcombine.high %v4103_v46, %v4103_v46  ;;  %v1925_v31 = vcombine.low %v4103_v46, %v4109_v20  ;;  %v659_v47 = vadd.f32 %v629_v61, %v4031_v44 }
 0x1bf   : > { %v1026_v22 = vadd.f32 %v996_v14, %v842_v28  ;;  %2983 = vmatprep.mubr.msk.f32.mxu0 %vm3139_vm0, %v3140_v30  ;;  %v1317_v36 = vadd.f32 %v1310_v8, %v1292_v59  ;;  %v1294_v13 = vadd.f32 %v1287_v3, %v1268_v33  ;;  %v1337_v8 = vmul.f32 %v3895_v26, %v1326_v6 }
 0x1c0   : > { %v1844_v58 = vrot.slane %v1828_v52, %v3921_v15  ;;  %v1186_v54 = vmul.f32 %v3838_v63, %v1175_v57  ;;  %v1514_v59 = vcombine.high %v1498_v25, %v1498_v25  ;;  %v1909_v50 = vcombine.low %v4123_v41, %v4126_v34 }
 0x1c1   : > { %v1061_v16 = vadd.f32 %v3982_v49, %v1026_v22  ;;  %v595_v60 = vpop.permute.xlu1 %594  ;;  %v1342_v39 = vadd.f32 %v4054_v17, %v1317_v36  ;;  %v1319_v18 = vadd.f32 %v1312_v55, %v1294_v13  ;;  %v2911_v17 = vcombine.high %v4064_v21, %v4067_v32 }
 0x1c2   : > { %v630_v40 = vmul.f32 %v3491_v24, %v595_v60  ;;  %v1168_v24 = vadd.f32 %v1161_v1, %v1143_v38  ;;  %v843_v63 = vadd.f32 %v813_v53, %v659_v47  ;;  %v1201_v61 = vld [vmem:[#allocation2 + $0xd0] sm:$0x7f] }
 0x1c3   : > { %v1091_v51 = vmax.f32 %v1061_v16, 0.0  ;;  %v1354_v2 = vadd.f32 %v3909_v23, %v1342_v39  ;;  %v1344_v27 = vadd.f32 %v1337_v8, %v1319_v18  ;;  %v1837_v33 = vrot.slane %v2911_v17, %v3921_v15 }
 0x1c4   : > { %v660_v21 = vadd.f32 %v630_v40, %v4035_v4  ;;  %v1193_v44 = vadd.f32 %v1186_v54, %v1168_v24  ;;  %v1212_v34 = vmul.f32 %v3848_v56, %v1201_v61 }
 0x1c5   : > { %1121 = vst [vmem:[#allocation2 + $0xd8] sm:$0xff] %v1091_v51  ;;  %v1361_v29 = vmax.f32 %v1354_v2, 0.0  ;;  %v1356_v5 = vadd.f32 %v3909_v23, %v1344_v27  ;;  %v1859_v22 = vcombine.low %v1837_v33, %v1844_v58 }
 0x1c6   : > { %v779_v32 = vpop.permute.xlu1 %778 }
 0x1c7   : > { %v814_v3 = vmul.f32 %v3504_v0, %v779_v32  ;;  %v1523_v48 = vrot.slane %v1361_v29, %v3921_v15  ;;  %v1516_v28 = vcombine.high %v1361_v29, %v1361_v29  ;;  %v1363_v14 = vmax.f32 %v1356_v5, 0.0 }
 0x1c9   : > { %v844_v9 = vadd.f32 %v814_v3, %v660_v21  ;;  %v1531_v4 = vcombine.high %v1523_v48, %v1523_v48  ;;  %v1539_v55 = vrot.slane %v1523_v48, %v3921_v15  ;;  %v1530_v6 = vrot.slane %v1516_v28, %v3921_v15 }
 0x1ca   : > { %v1612_v0 = vcombine.high %v1363_v14, %v1363_v14  ;;  %v1619_v36 = vrot.slane %v1363_v14, %v3921_v15 }
 0x1cb   : > { %v1028_v10 = vadd.f32 %v998_v37, %v844_v9  ;;  %v959_v13 = vpop.permute.xlu1 %958  ;;  %v1553_v62 = vrot.slane %v1531_v4, %v3921_v15  ;;  %v1561_v12 = vcombine.high %v1539_v55, %v1539_v55  ;;  %v1829_v25 = vcombine.low %v1514_v59, %v1539_v55 }
 0x1cc   : > { %v997_v35 = vmul.f32 %v3510_v19, %v959_v13  ;;  %v1532_v38 = vcombine.high %v1530_v6, %v1530_v6  ;;  %v1546_v16 = vrot.slane %v1530_v6, %v3921_v15  ;;  %v4149_v60 = vrot.slane %v1612_v0, %v3921_v15  ;;  %v1226_v21 = vld [vmem:[#allocation2 + $0xd8] sm:$0x7f] }
 0x1cd   : > { %v1063_v53 = vadd.f32 %v3982_v49, %v1028_v10  ;;  %v1830_v39 = vcombine.low %v1553_v62, %v1561_v12  ;;  %v1851_v18 = vrot.slane %v1829_v25, %v3921_v15  ;;  %v1563_v8 = vcombine.high %v1553_v62, %v1553_v62 }
 0x1ce   : > { %v1027_v40 = vadd.f32 %v997_v35, %v843_v63  ;;  %v1560_v52 = vrot.slane %v1532_v38, %v3921_v15  ;;  %v1562_v1 = vcombine.high %v1546_v16, %v1546_v16  ;;  %v1627_v51 = vcombine.high %v1619_v36, %v1619_v36 }
 0x1cf   : > { %v1093_v37 = vmax.f32 %v1063_v53, 0.0  ;;  %v1858_v19 = vrot.slane %v1830_v39, %v3921_v15  ;;  %v1876_v2 = vcombine.low %v1563_v8, %v1546_v16  ;;  %v1635_v27 = vrot.slane %v1619_v36, %v3921_v15  ;;  %v1251_v36 = vld [vmem:[#allocation2 + $0xd1] sm:$0x7f] }
 0x1d0   : > { %v1062_v57 = vadd.f32 %v3982_v49, %v1027_v40  ;;  %v1877_v17 = vcombine.low %v1560_v52, %v1562_v1  ;;  %v1649_v41 = vrot.slane %v1627_v51, %v3921_v15  ;;  %v1642_v54 = vrot.slane %v4149_v60, %v3921_v15 }
 0x1d1   : > { %1123 = vst [vmem:[#allocation2 + $0xe8] sm:$0xff] %v1093_v37  ;;  %v1860_v24 = vcombine.low %v1851_v18, %v1858_v19  ;;  %v1886_v29 = vrot.slane %v1876_v2, %v3921_v15  ;;  %v1657_v5 = vcombine.high %v1635_v27, %v1635_v27  ;;  %v1926_v47 = vcombine.low %v1610_v11, %v1635_v27 }
 0x1d2   : > { %v1092_v32 = vmax.f32 %v1062_v57, 0.0  ;;  %v1893_v58 = vrot.slane %v1877_v17, %v3921_v15  ;;  %v1659_v3 = vcombine.high %v1649_v41, %v1649_v41  ;;  %v1867_v49 = vrot.slane %v1859_v22, %v3921_v15 }
 0x1d3   : > { %v1874_v48 = vrot.slane %v1860_v24, %v3921_v15  ;;  %v1927_v28 = vcombine.low %v1649_v41, %v1657_v5  ;;  %v1942_v56 = vrot.slane %v1926_v47, %v3921_v15  ;;  %v1935_v11 = vrot.slane %v1925_v31, %v3921_v15 }
 0x1d4   : > { %1122 = vst [vmem:[#allocation2 + $0xe0] sm:$0xff] %v1092_v32  ;;  %v1908_v14 = vcombine.low %v1886_v29, %v1893_v58  ;;  %v1928_v59 = vcombine.low %v1659_v3, %v1642_v54  ;;  %v1237_v33 = vmul.f32 %v3857_v45, %v1226_v21  ;;  %v1219_v4 = vadd.f32 %v1212_v34, %v1193_v44 }
 0x1d5   : > { %v1875_v9 = vcombine.low %v1867_v49, %v1874_v48  ;;  %v1949_v6 = vrot.slane %v1927_v28, %v3921_v15  ;;  %v1957_v22 = vcombine.low %v1935_v11, %v1942_v56  ;;  %v1923_v0 = vrot.slane %v1909_v50, %v3921_v15  ;;  %v4208_v48 = vld [vmem:[%s4323_s4 + $0x2] ss:$0 sm:$0xff] }
 0x1d6   : > { %v1916_v55 = vrot.slane %v1908_v14, %v3921_v15  ;;  %v1956_v63 = vrot.slane %v1928_v59, %v3921_v15  ;;  %v1244_v20 = vadd.f32 %v1237_v33, %v1219_v4  ;;  %v1262_v10 = vmul.f32 %v3864_v42, %v1251_v36 }
 0x1d7   : > { %2984 = vmatmul.mubr.f32.gmra.mrb[4].mxu0 %v1875_v9  ;;  %v1965_v45 = vrot.slane %v1957_v22, %v3921_v15  ;;  %v1628_v8 = vcombine.high %v4149_v60, %v4149_v60  ;;  %v1658_v40 = vcombine.high %v1642_v54, %v1642_v54 }
 0x1d8   : > { %2986 = vmatprep.mubr.msk.f32.mxu0 %vm3139_vm0, %v3140_v30  ;;  %v1958_v46 = vcombine.low %v1949_v6, %v1956_v63  ;;  %v1924_v31 = vcombine.low %v1916_v55, %v1923_v0  ;;  %v1302_v62 = vld [vmem:[#allocation2 + $0xe8] sm:$0x7f]  ;;  %v1269_v25 = vadd.f32 %v1262_v10, %v1244_v20 }
 0x1d9   : > { %v1313_v16 = vmul.f32 %v3880_v43, %v1302_v62 }
 0x1da   : > { %v1972_v44 = vrot.slane %v1958_v46, %v3921_v15 }
 0x1db   : > { %2987 = vmatmul.mubr.f32.gmra.mrb[6].mxu0 %v1924_v31  ;;  %v1277_v13 = vld [vmem:[#allocation2 + $0xe0] sm:$0x7f] }
 0x1dc   : > { %v1973_v12 = vcombine.low %v1965_v45, %v1972_v44  ;;  %v1288_v50 = vmul.f32 %v3872_v7, %v1277_v13  ;;  %v1327_v35 = vld [vmem:[#allocation2 + $0xe1] sm:$0x7f]  ;;  %v1656_v7 = vrot.slane %v1628_v8, %v3921_v15 }
 0x1dd   : > { %v1338_v39 = vmul.f32 %v3895_v26, %v1327_v35 }
 0x1de   : > { %2990 = vmatmul.mubr.f32.vlgmr.msra.gmra.mrb[0].mxu1 %v1973_v12  ;;  %v1295_v38 = vadd.f32 %v1288_v50, %v1269_v25  ;;  %v1974_v2 = vcombine.low %v1656_v7, %v1658_v40 }
 0x1df   : > { %2992 = vmatprep.mubr.msk.f32.mxu1 %vm3139_vm0, %v3140_v30 }
 0x1e0   : > { %v1320_v53 = vadd.f32 %v1313_v16, %v1295_v38  ;;  %v1984_v41 = vrot.slane %v1974_v2, %v3921_v15 }
 0x1e2   : > { %v1345_v18 = vadd.f32 %v1338_v39, %v1320_v53 }
 0x1e4   : > { %v1357_v42 = vadd.f32 %v3909_v23, %v1345_v18 }
 0x1e6   : > { %v1364_v61 = vmax.f32 %v1357_v42, 0.0 }
 0x1e8   : > { %v1660_v52 = vcombine.high %v1364_v61, %v1364_v61  ;;  %v1667_v1 = vrot.slane %v1364_v61, %v3921_v15 }
 0x1ea   : > { %v1674_v43 = vrot.slane %v1660_v52, %v3921_v15  ;;  %v1675_v51 = vcombine.high %v1667_v1, %v1667_v1  ;;  %v1683_v19 = vrot.slane %v1667_v1, %v3921_v15 }
 0x1ec   : > { %v1676_v37 = vcombine.high %v1674_v43, %v1674_v43  ;;  %v1697_v26 = vrot.slane %v1675_v51, %v3921_v15  ;;  %v1690_v23 = vrot.slane %v1674_v43, %v3921_v15 }
 0x1ee   : > { %v1704_v60 = vrot.slane %v1676_v37, %v3921_v15  ;;  %v1975_v27 = vcombine.low %v1683_v19, %v1697_v26  ;;  %v2913_v57 = vcombine.high %v1683_v19, %v1697_v26  ;;  %v1706_v21 = vcombine.high %v1690_v23, %v1690_v23 }
 0x1f0   : > { %v1977_v17 = vcombine.low %v1690_v23, %v1704_v60  ;;  %v1991_v34 = vrot.slane %v1975_v27, %v3921_v15  ;;  %v1998_v24 = vrot.slane %v2913_v57, %v3921_v15  ;;  %v2029_v3 = vrot.slane %v1706_v21, %v3921_v15 }
 0x1f2   : > { %v2005_v29 = vrot.slane %v1977_v17, %v3921_v15  ;;  %v2006_v5 = vcombine.low %v1984_v41, %v1991_v34  ;;  %v2036_v49 = vrot.slane %v2029_v3, %v3921_v15 }
 0x1f4   : > { %v2007_v47 = vcombine.low %v1998_v24, %v2005_v29  ;;  %v2014_v32 = vrot.slane %v2006_v5, %v3921_v15 }
 0x1f6   : > { %v2021_v58 = vrot.slane %v2007_v47, %v3921_v15 }
 0x1f8   : > { %v2022_v54 = vcombine.low %v2014_v32, %v2021_v58 }
 0x1fa   : > { %2993 = vmatmul.mubr.f32.gmra.mrb[2].mxu1 %v2022_v54 }
 0x1fb   : > { %2995 = vmatprep.mubr.msk.f32.mxu1 %vm3139_vm0, %v3140_v30 }
 0x1fe   : > { %2996 = vmatmul.mubr.f32.gmra.mrb[4].mxu1 %v2036_v49 }
 0x274   : > { %v2110_v28 = vpop.f32.mrb[0].mxu0 }
 0x275   : > { %v2111_v56 = vadd.f32 %v4208_v48, %v2110_v28  ;;  %v2979_v14 = vpop.f32.mrb[1].mxu0 }
 0x277   : > { %v2151_v59 = vcombine.high %v2111_v56, %v2111_v56  ;;  %v2158_v11 = vrot.slane %v2111_v56, %v3921_v15 }
 0x279   : > { %v2165_v33 = vrot.slane %v2151_v59, %v3921_v15  ;;  %v2166_v9 = vcombine.high %v2158_v11, %v2158_v11  ;;  %v2174_v4 = vrot.slane %v2158_v11, %v3921_v15 }
 0x27b   : > { %v2167_v30 = vcombine.high %v2165_v33, %v2165_v33  ;;  %v2181_v55 = vrot.slane %v2165_v33, %v3921_v15  ;;  %v2188_v6 = vrot.slane %v2166_v9, %v3921_v15 }
 0x27d   : > { %v2195_v63 = vrot.slane %v2167_v30, %v3921_v15  ;;  %v2197_v22 = vcombine.high %v2181_v55, %v2181_v55  ;;  %v2459_v0 = vcombine.low %v2174_v4, %v2188_v6  ;;  %v2914_v36 = vcombine.high %v2174_v4, %v2188_v6 }
 0x27f   : > { %v2461_v46 = vcombine.low %v2181_v55, %v2195_v63  ;;  %v2468_v20 = vrot.slane %v2459_v0, %v3921_v15  ;;  %v2475_v31 = vrot.slane %v2914_v36, %v3921_v15  ;;  %v2489_v44 = vrot.slane %v2197_v22, %v3921_v15 }
 0x280   : > { %v2199_v8 = vcombine.high %v2195_v63, %v2195_v63 }
 0x281   : > { %v2482_v45 = vrot.slane %v2461_v46, %v3921_v15  ;;  %v2490_v10 = vcombine.low %v2468_v20, %v2475_v31 }
 0x283   : > { %v2491_v13 = vcombine.low %v2482_v45, %v2489_v44  ;;  %v2498_v62 = vrot.slane %v2490_v10, %v3921_v15 }
 0x285   : > { %v2505_v12 = vrot.slane %v2491_v13, %v3921_v15 }
 0x287   : > { %v2506_v25 = vcombine.low %v2498_v62, %v2505_v12 }
 0x289   : > { %2802 = vst [vmem:[%s4227_s8] sm:$0x7f] %v2506_v25 }
 0x291   : > { %v2115_v50 = vpop.f32.mrb[2].mxu0 }
 0x292   : > { %v2116_v35 = vadd.f32 %v4208_v48, %v2115_v50  ;;  %v2982_v38 = vpop.f32.mrb[3].mxu0 }
 0x294   : > { %v2200_v16 = vcombine.high %v2116_v35, %v2116_v35  ;;  %v2207_v53 = vrot.slane %v2116_v35, %v3921_v15 }
 0x296   : > { %v2214_v39 = vrot.slane %v2200_v16, %v3921_v15  ;;  %v2215_v18 = vcombine.high %v2207_v53, %v2207_v53  ;;  %v2223_v42 = vrot.slane %v2207_v53, %v3921_v15 }
 0x298   : > { %v2216_v61 = vcombine.high %v2214_v39, %v2214_v39  ;;  %v2237_v7 = vrot.slane %v2215_v18, %v3921_v15  ;;  %v2245_v40 = vcombine.high %v2223_v42, %v2223_v42  ;;  %v2507_v52 = vcombine.low %v2199_v8, %v2223_v42 }
 0x299   : > { %v2230_v1 = vrot.slane %v2214_v39, %v3921_v15 }
 0x29a   : > { %v2244_v43 = vrot.slane %v2216_v61, %v3921_v15  ;;  %v2247_v51 = vcombine.high %v2237_v7, %v2237_v7  ;;  %v2508_v37 = vcombine.low %v2237_v7, %v2245_v40  ;;  %v2516_v26 = vrot.slane %v2507_v52, %v3921_v15 }
 0x29c   : > { %v2509_v19 = vcombine.low %v2247_v51, %v2230_v1  ;;  %v2523_v2 = vrot.slane %v2508_v37, %v3921_v15  ;;  %v2537_v60 = vrot.slane %v2244_v43, %v3921_v15  ;;  %v2915_v32 = vcombine.high %v2230_v1, %v2244_v43 }
 0x29e   : > { %v2530_v23 = vrot.slane %v2509_v19, %v3921_v15  ;;  %v2538_v27 = vcombine.low %v2516_v26, %v2523_v2  ;;  %v2564_v30 = vrot.slane %v2915_v32, %v3921_v15 }
 0x2a0   : > { %v2539_v57 = vcombine.low %v2530_v23, %v2537_v60  ;;  %v2546_v17 = vrot.slane %v2538_v27, %v3921_v15 }
 0x2a2   : > { %v2553_v41 = vrot.slane %v2539_v57, %v3921_v15 }
 0x2a4   : > { %v2554_v34 = vcombine.low %v2546_v17, %v2553_v41 }
 0x2a6   : > { %2803 = vst [vmem:[%s4227_s8 + $0x8] sm:$0x7f] %v2554_v34 }
 0x2aa   : > { %v2120_v24 = vpop.f32.mrb[4].mxu0 }
 0x2ab   : > { %v2121_v29 = vadd.f32 %v4208_v48, %v2120_v24  ;;  %v2985_v5 = vpop.f32.mrb[5].mxu0 }
 0x2ad   : > { %v2249_v47 = vcombine.high %v2121_v29, %v2121_v29  ;;  %v2256_v21 = vrot.slane %v2121_v29, %v3921_v15 }
 0x2ae   : > { %v2125_v58 = vpop.f32.mrb[6].mxu0 }
 0x2af   : > { %v2263_v54 = vrot.slane %v2249_v47, %v3921_v15  ;;  %v2264_v3 = vcombine.high %v2256_v21, %v2256_v21  ;;  %v2126_v49 = vadd.f32 %v4208_v48, %v2125_v58  ;;  %v2988_v28 = vpop.f32.mrb[7].mxu0  ;;  %v2272_v56 = vrot.slane %v2256_v21, %v3921_v15 }
 0x2b1   : > { %v2265_v14 = vcombine.high %v2263_v54, %v2263_v54  ;;  %v2279_v59 = vrot.slane %v2263_v54, %v3921_v15  ;;  %v2286_v11 = vrot.slane %v2264_v3, %v3921_v15  ;;  %v2298_v33 = vcombine.high %v2126_v49, %v2126_v49  ;;  %v2130_v9 = vpop.f32.mrb[0].mxu1 }
 0x2b2   : > { %v2305_v4 = vrot.slane %v2126_v49, %v3921_v15  ;;  %v2131_v55 = vadd.f32 %v4208_v48, %v2130_v9  ;;  %v2991_v6 = vpop.f32.mrb[1].mxu1 }
 0x2b3   : > { %v2293_v63 = vrot.slane %v2265_v14, %v3921_v15  ;;  %v2295_v22 = vcombine.high %v2279_v59, %v2279_v59  ;;  %v2556_v0 = vcombine.low %v2272_v56, %v2286_v11  ;;  %v2916_v36 = vcombine.high %v2272_v56, %v2286_v11 }
 0x2b4   : > { %v2585_v46 = vrot.slane %v2279_v59, %v3921_v15  ;;  %v2312_v20 = vrot.slane %v2298_v33, %v3921_v15  ;;  %v2313_v31 = vcombine.high %v2305_v4, %v2305_v4  ;;  %v2321_v45 = vrot.slane %v2305_v4, %v3921_v15 }
 0x2b5   : > { %v2571_v44 = vrot.slane %v2556_v0, %v3921_v15  ;;  %v2578_v10 = vrot.slane %v2916_v36, %v3921_v15  ;;  %v2603_v13 = vcombine.low %v2293_v63, %v2295_v22  ;;  %v2297_v62 = vcombine.high %v2293_v63, %v2293_v63 }
 0x2b6   : > { %v2314_v12 = vcombine.high %v2312_v20, %v2312_v20  ;;  %v2335_v25 = vrot.slane %v2313_v31, %v3921_v15  ;;  %v2343_v50 = vcombine.high %v2321_v45, %v2321_v45  ;;  %v2328_v16 = vrot.slane %v2312_v20, %v3921_v15 }
 0x2b7   : > { %v2586_v35 = vcombine.low %v2564_v30, %v2571_v44  ;;  %v2587_v38 = vcombine.low %v2578_v10, %v2585_v46  ;;  %v2604_v53 = vcombine.low %v2297_v62, %v2321_v45  ;;  %v2612_v8 = vrot.slane %v2603_v13, %v3921_v15 }
 0x2b8   : > { %v2342_v39 = vrot.slane %v2314_v12, %v3921_v15  ;;  %v2345_v18 = vcombine.high %v2335_v25, %v2335_v25  ;;  %v2605_v42 = vcombine.low %v2335_v25, %v2343_v50  ;;  %v2354_v52 = vrot.slane %v2131_v55, %v3921_v15 }
 0x2b9   : > { %v2594_v61 = vrot.slane %v2586_v35, %v3921_v15  ;;  %v2601_v7 = vrot.slane %v2587_v38, %v3921_v15  ;;  %v2619_v40 = vrot.slane %v2604_v53, %v3921_v15  ;;  %v2347_v41 = vcombine.high %v2131_v55, %v2131_v55 }
 0x2ba   : > { %v2626_v1 = vrot.slane %v2605_v42, %v3921_v15  ;;  %v2633_v43 = vrot.slane %v2345_v18, %v3921_v15  ;;  %v2651_v51 = vcombine.low %v2328_v16, %v2342_v39  ;;  %v2917_v37 = vcombine.high %v2328_v16, %v2342_v39 }
 0x2bb   : > { %v2602_v19 = vcombine.low %v2594_v61, %v2601_v7  ;;  %v2634_v26 = vcombine.low %v2612_v8, %v2619_v40  ;;  %v2362_v2 = vcombine.high %v2354_v52, %v2354_v52  ;;  %v2370_v57 = vrot.slane %v2354_v52, %v3921_v15 }
 0x2bc   : > { %v2635_v23 = vcombine.low %v2626_v1, %v2633_v43  ;;  %v2660_v60 = vrot.slane %v2651_v51, %v3921_v15  ;;  %v2667_v27 = vrot.slane %v2917_v37, %v3921_v15  ;;  %v2361_v32 = vrot.slane %v2347_v41, %v3921_v15 }
 0x2bd   : > { %2804 = vst [vmem:[%s4227_s8 + $0x10] sm:$0x7f] %v2602_v19  ;;  %v2642_v17 = vrot.slane %v2634_v26, %v3921_v15  ;;  %v2384_v34 = vrot.slane %v2362_v2, %v3921_v15  ;;  %v2392_v29 = vcombine.high %v2370_v57, %v2370_v57 }
 0x2be   : > { %v2649_v24 = vrot.slane %v2635_v23, %v3921_v15  ;;  %v2682_v5 = vcombine.low %v2660_v60, %v2667_v27  ;;  %v2363_v28 = vcombine.high %v2361_v32, %v2361_v32  ;;  %v2377_v56 = vrot.slane %v2361_v32, %v3921_v15 }
 0x2bf   : > { %v2653_v47 = vcombine.low %v2370_v57, %v2384_v34  ;;  %v2681_v54 = vrot.slane %v2392_v29, %v3921_v15  ;;  %v2394_v9 = vcombine.high %v2384_v34, %v2384_v34 }
 0x2c0   : > { %v2650_v21 = vcombine.low %v2642_v17, %v2649_v24  ;;  %v2690_v3 = vrot.slane %v2682_v5, %v3921_v15  ;;  %v2391_v11 = vrot.slane %v2363_v28, %v3921_v15  ;;  %v2393_v33 = vcombine.high %v2377_v56, %v2377_v56 }
 0x2c1   : > { %v2674_v58 = vrot.slane %v2653_v47, %v3921_v15  ;;  %v2699_v30 = vcombine.low %v2394_v9, %v2377_v56 }
 0x2c2   : > { %2805 = vst [vmem:[%s4227_s8 + $0x18] sm:$0x7f] %v2650_v21  ;;  %v2700_v4 = vcombine.low %v2391_v11, %v2393_v33  ;;  %v2395_v20 = vcombine.high %v2391_v11, %v2391_v11 }
 0x2c3   : > { %v2683_v49 = vcombine.low %v2674_v58, %v2681_v54  ;;  %v2708_v36 = vrot.slane %v2699_v30, %v3921_v15 }
 0x2c4   : > { %v2715_v46 = vrot.slane %v2700_v4, %v3921_v15 }
 0x2c5   : > { %v2697_v14 = vrot.slane %v2683_v49, %v3921_v15 }
 0x2c6   : > { %v2730_v35 = vcombine.low %v2708_v36, %v2715_v46 }
 0x2c7   : > { %v2698_v59 = vcombine.low %v2690_v3, %v2697_v14 }
 0x2c8   : > { %v2738_v40 = vrot.slane %v2730_v35, %v3921_v15 }
 0x2c9   : > { %2806 = vst [vmem:[%s4227_s8 + $0x20] sm:$0x7f] %v2698_v59 }
 0x2cd   : > { %v2135_v55 = vpop.f32.mrb[2].mxu1 }
 0x2ce   : > { %v2136_v6 = vadd.f32 %v4208_v48, %v2135_v55  ;;  %v2994_v63 = vpop.f32.mrb[3].mxu1 }
 0x2d0   : > { %v2396_v22 = vcombine.high %v2136_v6, %v2136_v6  ;;  %v2403_v0 = vrot.slane %v2136_v6, %v3921_v15 }
 0x2d1   : > { %v2140_v31 = vpop.f32.mrb[4].mxu1 }
 0x2d2   : > { %v2410_v45 = vrot.slane %v2396_v22, %v3921_v15  ;;  %v2411_v44 = vcombine.high %v2403_v0, %v2403_v0  ;;  %v2419_v10 = vrot.slane %v2403_v0, %v3921_v15  ;;  %v2141_v13 = vadd.f32 %v4208_v48, %v2140_v31  ;;  %v2997_v62 = vpop.f32.mrb[5].mxu1 }
 0x2d4   : > { %v2412_v12 = vcombine.high %v2410_v45, %v2410_v45  ;;  %v2433_v25 = vrot.slane %v2411_v44, %v3921_v15  ;;  %v2701_v50 = vcombine.low %v2395_v20, %v2419_v10  ;;  %v2426_v38 = vrot.slane %v2410_v45, %v3921_v15 }
 0x2d5   : > { %v2451_v16 = vrot.slane %v2141_v13, %v3921_v15 }
 0x2d6   : > { %v2440_v53 = vrot.slane %v2412_v12, %v3921_v15  ;;  %v2722_v39 = vrot.slane %v2701_v50, %v3921_v15  ;;  %v2729_v18 = vrot.slane %v2433_v25, %v3921_v15  ;;  %v2918_v42 = vcombine.high %v2419_v10, %v2433_v25 }
 0x2d7   : > { %v2458_v48 = vrot.slane %v2451_v16, %v3921_v15 }
 0x2d8   : > { %v2731_v8 = vcombine.low %v2722_v39, %v2729_v18  ;;  %v2748_v61 = vcombine.low %v2426_v38, %v2440_v53  ;;  %v2919_v7 = vcombine.high %v2426_v38, %v2440_v53  ;;  %v2756_v52 = vrot.slane %v2918_v42, %v3921_v15 }
 0x2d9   : > { %v2777_v37 = vrot.slane %v2458_v48, %v3921_v15 }
 0x2da   : > { %v2745_v1 = vrot.slane %v2731_v8, %v3921_v15  ;;  %v2763_v43 = vrot.slane %v2748_v61, %v3921_v15  ;;  %v2770_v51 = vrot.slane %v2919_v7, %v3921_v15 }
 0x2dc   : > { %v2746_v19 = vcombine.low %v2738_v40, %v2745_v1  ;;  %v2778_v26 = vcombine.low %v2756_v52, %v2763_v43  ;;  %v2779_v2 = vcombine.low %v2770_v51, %v2777_v37 }
 0x2de   : > { %v2786_v23 = vrot.slane %v2778_v26, %v3921_v15  ;;  %2807 = vst [vmem:[%s4227_s8 + $0x28] sm:$0x7f] %v2746_v19  ;;  %v2793_v60 = vrot.slane %v2779_v2, %v3921_v15 }
 0x2e0   : > { %v2794_v27 = vcombine.low %v2786_v23, %v2793_v60 }
 0x2e2   : > { %2808 = vst [vmem:[%s4227_s8 + $0x30] sm:$0x7f] %v2794_v27 }
 0x2e3 PF: > { %s15_s20 = sadd.s32 1, %s3132_s20   ;;  %s4377_s18 = smov %s3128_s19 }
 0x2e4   : > { %p12_p5 = scmp.ge.s32.totalorder %s15_s20, 4   ;;  %s4378_s19 = smov %s4380_s21 }
 0x2e6   :  { %14 = sbr.rel (!%p12_p5) target bundleno = 2 (0x2), region = 72 }

</bundles_post_ra>
